<compile_context>
chip_gen: v7x
topology: tpu7x:2x2x1
jax: 0.10.0
libtpu: 0.0.40
codegen_flags: <defaults>
</compile_context>

<pallas_src>
import functools

import jax
import jax.numpy as jnp
import numpy as np
from jax.experimental import pallas as pl
from jax.experimental.pallas import tpu as pltpu

EPS = 1e-5  # nn.BatchNorm2d default


# ----------------------------- Pallas kernel ------------------------------- #

def _bn_train(y, gamma, beta, n_pixels):
    """BatchNorm2d training-mode forward on channel-major (C, P) data.
    Fused single-pass statistics: E[x], E[x^2] (biased variance, like torch)."""
    inv_n = 1.0 / n_pixels
    mean = jnp.sum(y, axis=1, keepdims=True) * inv_n           # (C, 1)
    ex2 = jnp.sum(y * y, axis=1, keepdims=True) * inv_n        # (C, 1)
    var = ex2 - mean * mean
    return (y - mean) * (jax.lax.rsqrt(var + EPS) * gamma) + beta


def _resblock_kernel(resize, H, W, P, Cin, Cout, mm_dtype,
                     xpt_ref, mask_ref, w1_ref, w2_ref, gamma_ref, beta_ref,
                     out_ref, col1_ref, col2_ref, pad2_ref):
    halo = W + 1
    gamma = gamma_ref[...]        # (Cout, 1)
    beta = beta_ref[...]          # (Cout, 1)

    # ---- conv1 im2col: 9 statically shifted + masked lane slices of the
    #      1-D-padded channel-major input (Cin, P + 2*halo).
    for t in range(9):
        dh, dw = t // 3 - 1, t % 3 - 1
        s = halo + dh * W + dw
        col1_ref[t * Cin:(t + 1) * Cin, :] = (
            xpt_ref[:, s:s + P] * mask_ref[t:t + 1, :])

    # Single MXU matmul: contraction dim 9*Cin, output lanes = P (lane-dense).
    acc1 = jnp.dot(w1_ref[...].astype(mm_dtype),
                   col1_ref[...].astype(mm_dtype),
                   preferred_element_type=jnp.float32)          # (Cout, P)
    bn1 = _bn_train(acc1, gamma, beta, P)

    # ---- ReLU(conv1) written straight into the interior of the lane-padded
    #      conv2 source buffer; only the thin halos get zeroed.
    pad2_ref[:, 0:halo] = jnp.zeros((Cout, halo), jnp.float32)
    pad2_ref[:, halo + P:2 * halo + P] = jnp.zeros((Cout, halo), jnp.float32)
    pad2_ref[:, halo:halo + P] = jnp.maximum(bn1, 0.0)

    # ---- conv2 im2col + single matmul.
    for t in range(9):
        dh, dw = t // 3 - 1, t % 3 - 1
        s = halo + dh * W + dw
        col2_ref[t * Cout:(t + 1) * Cout, :] = (
            pad2_ref[:, s:s + P] * mask_ref[t:t + 1, :])

    acc2 = jnp.dot(w2_ref[...].astype(mm_dtype),
                   col2_ref[...].astype(mm_dtype),
                   preferred_element_type=jnp.float32)          # (Cout, P)
    bn2 = _bn_train(acc2, gamma, beta, P)

    # ---- residual + final ReLU (PyTorch reuses conv1 for the resize shortcut,
    #      so its value is identical to bn1; identity shortcut otherwise).
    residual = bn1 if resize else xpt_ref[:, halo:halo + P]
    out_ref[...] = jnp.maximum(residual + bn2, 0.0)


# ------------------------------ glue / wrapper ------------------------------ #

def _make_tap_masks(N, H, W):
    """(9, N*H*W) validity masks for the 9 (dh, dw) taps in the flattened
    pixel layout (zero where the shifted neighbour is out of the image)."""
    P = N * H * W
    r = np.arange(P)
    w_pos = r % W
    h_pos = (r // W) % H
    m = np.zeros((9, P), np.float32)
    for t in range(9):
        dh, dw = t // 3 - 1, t % 3 - 1
        ok = ((w_pos + dw >= 0) & (w_pos + dw < W) &
              (h_pos + dh >= 0) & (h_pos + dh < H))
        m[t] = ok
    return jnp.asarray(m)


def _taps_from_convT(w):
    """ConvTranspose2d weight (Cin, Cout, k, k) -> (Cout, k*k*Cin) with tap-major
    column order.  Stride-1 conv-transpose == correlation with flipped taps."""
    cin, cout, k, _ = w.shape
    w_eff = jnp.flip(w, axis=(2, 3))                      # [ci, co, kh, kw]
    return jnp.transpose(w_eff, (1, 2, 3, 0)).reshape(cout, k * k * cin)


def _taps_from_conv(w):
    """Conv2d weight (Cout, Cin, k, k) -> (Cout, k*k*Cin), tap-major columns."""
    cout, cin, k, _ = w.shape
    return jnp.transpose(w, (0, 2, 3, 1)).reshape(cout, k * k * cin)


def make_res_block_params(key, c_in, c_out, k=3, mode='decode'):
    k1, k2, k3, k4 = jax.random.split(key, 4)
    if mode == 'decode':
        w1 = jax.random.normal(k1, (c_in, c_out, k, k), jnp.float32) * 0.1
        w2 = jax.random.normal(k2, (c_out, c_out, k, k), jnp.float32) * 0.1
    else:
        w1 = jax.random.normal(k1, (c_out, c_in, k, k), jnp.float32) * 0.1
        w2 = jax.random.normal(k2, (c_out, c_out, k, k), jnp.float32) * 0.1
    b1 = jax.random.normal(k3, (c_out,), jnp.float32) * 0.1
    b2 = jax.random.normal(k4, (c_out,), jnp.float32) * 0.1
    gamma = jnp.ones((c_out,), jnp.float32)    # BatchNorm2d default weight
    beta = jnp.zeros((c_out,), jnp.float32)    # BatchNorm2d default bias
    return dict(w1=w1, b1=b1, w2=w2, b2=b2, gamma=gamma, beta=beta)


def res_block_forward(x_nchw, params, *, mode='decode', k=3, s=1, p=1,
                      matmul_dtype=jnp.float32):
    """x_nchw: (N, C_in, H, W) float32  ->  (N, C_out, H, W) float32.

    matmul_dtype=jnp.bfloat16 is the v6e-recommended setting at production
    channel widths (f32 accumulation is kept via preferred_element_type)."""
    assert mode in ('encode', 'decode')
    assert k == 3 and s == 1 and p == 1, "only the k=3, s=1, p=1 block is implemented"
    # TODO(synk): strided (up/down-sampling) variants of this block are not implemented.

    N, Cin, H, W = x_nchw.shape
    Cout = params['b1'].shape[0]
    resize = (s > 1) or (s == 1 and p == 0) or (Cout != Cin)
    if not resize:
        assert Cin == Cout

    P = N * H * W
    halo = W + 1

    # Layout plumbing in the wrapper: NCHW -> channel-major (Cin, N*H*W),
    # zero-padded by (W+1) along the pixel axis for the tap shifts.
    x_cp = jnp.transpose(x_nchw.astype(jnp.float32), (1, 0, 2, 3)).reshape(Cin, P)
    xpt = jnp.pad(x_cp, ((0, 0), (halo, halo)))

    masks = _make_tap_masks(N, H, W)                        # (9, P)

    if mode == 'decode':
        w1t = _taps_from_convT(params['w1'])
        w2t = _taps_from_convT(params['w2'])
    else:
        w1t = _taps_from_conv(params['w1'])
        w2t = _taps_from_conv(params['w2'])

    gamma = params['gamma'].reshape(Cout, 1).astype(jnp.float32)
    beta = params['beta'].reshape(Cout, 1).astype(jnp.float32)
    # NOTE: params['b1'] / params['b2'] are intentionally NOT passed: a constant
    # per-channel bias is removed exactly by training-mode BatchNorm.

    kern = functools.partial(_resblock_kernel, resize, H, W, P, Cin, Cout,
                             matmul_dtype)
    vmem = pl.BlockSpec(memory_space=pltpu.MemorySpace.VMEM)

    out_cp = pl.pallas_call(
        kern,
        out_shape=jax.ShapeDtypeStruct((Cout, P), jnp.float32),   # lane-dense output
        in_specs=[vmem] * 6,
        out_specs=vmem,
        scratch_shapes=[
            pltpu.VMEM((9 * Cin, P), jnp.float32),            # conv1 im2col
            pltpu.VMEM((9 * Cout, P), jnp.float32),           # conv2 im2col
            pltpu.VMEM((Cout, P + 2 * halo), jnp.float32),    # lane-padded relu1
        ],
    )(xpt, masks, w1t, w2t, gamma, beta)

    # (Cout, N*H*W) -> NCHW
    return jnp.transpose(out_cp.reshape(Cout, N, H, W), (1, 0, 2, 3))


# --------------------------- pure-JAX reference ----------------------------- #

def _bn_ref(y, gamma, beta):
    mean = jnp.mean(y, axis=(0, 2, 3), keepdims=True)
    var = jnp.mean((y - mean) ** 2, axis=(0, 2, 3), keepdims=True)
    return ((y - mean) / jnp.sqrt(var + EPS) * gamma[None, :, None, None]
            + beta[None, :, None, None])


def _convT_ref(x, w, b):
    # ConvTranspose2d(k=3, s=1, p=1): correlation with flipped kernel, channels swapped.
    w_conv = jnp.transpose(jnp.flip(w, axis=(2, 3)), (1, 0, 2, 3))  # (Cout, Cin, 3, 3)
    y = jax.lax.conv_general_dilated(
        x, w_conv, window_strides=(1, 1), padding=((1, 1), (1, 1)),
        dimension_numbers=('NCHW', 'OIHW', 'NCHW'))
    return y + b[None, :, None, None]


def ref_forward(x, params, resize):
    g, bt = params['gamma'], params['beta']
    conv1 = _bn_ref(_convT_ref(x, params['w1'], params['b1']), g, bt)
    relu = jnp.maximum(conv1, 0.0)
    conv2 = _bn_ref(_convT_ref(relu, params['w2'], params['b2']), g, bt)
    res = conv1 if resize else x
    return jnp.maximum(res + conv2, 0.0)


# ----------------------------------- main ----------------------------------- #

if __name__ == "__main__":
    key = jax.random.PRNGKey(0)
    kx1, kp1, kx2, kp2 = jax.random.split(key, 4)

    # Case 1: Cout != Cin -> exercises the resize (conv1 shortcut) branch.
    N, Cin, H, W = 2, 4, 16, 16
    Cout = 8
    x1 = jax.random.normal(kx1, (N, Cin, H, W), jnp.float32)
    p1 = make_res_block_params(kp1, Cin, Cout, k=3, mode='decode')
    out1 = jax.block_until_ready(res_block_forward(x1, p1, mode='decode'))
    ref1 = ref_forward(x1, p1, resize=True)
    np.testing.assert_allclose(np.asarray(out1), np.asarray(ref1),
                               rtol=2e-3, atol=2e-3)

    # Case 2: Cout == Cin -> exercises the identity shortcut branch.
    C2 = 8
    x2 = jax.random.normal(kx2, (N, C2, H, W), jnp.float32)
    p2 = make_res_block_params(kp2, C2, C2, k=3, mode='decode')
    out2 = jax.block_until_ready(res_block_forward(x2, p2, mode='decode'))
    ref2 = ref_forward(x2, p2, resize=False)
    np.testing.assert_allclose(np.asarray(out2), np.asarray(ref2),
                               rtol=2e-3, atol=2e-3)

    print("KERNEL_OK")
</pallas_src>

<mosaic_0001>
module attributes {stable_mosaic.version = 11 : i64} {
  func.func @_resblock_kernel(%arg0: memref<4x546xf32, #tpu.memory_space<vmem>>, %arg1: memref<9x512xf32, #tpu.memory_space<vmem>>, %arg2: memref<8x36xf32, #tpu.memory_space<vmem>>, %arg3: memref<8x72xf32, #tpu.memory_space<vmem>>, %arg4: memref<8x1xf32, #tpu.memory_space<vmem>>, %arg5: memref<8x1xf32, #tpu.memory_space<vmem>>, %arg6: memref<8x512xf32, #tpu.memory_space<vmem>>, %arg7: memref<36x512xf32, #tpu.memory_space<vmem>>, %arg8: memref<72x512xf32, #tpu.memory_space<vmem>>, %arg9: memref<8x546xf32, #tpu.memory_space<vmem>>) attributes {dimension_semantics = [], scalar_prefetch = 0 : i64, scratch_operands = 3 : i64, tpu.core_type = #tpu.core_type<tc>} {
    %c0 = arith.constant 0 : index
    %c0_0 = arith.constant 0 : index
    %0 = vector.load %arg4[%c0, %c0_0] : memref<8x1xf32, #tpu.memory_space<vmem>>, vector<8x1xf32>
    %c0_1 = arith.constant 0 : index
    %c0_2 = arith.constant 0 : index
    %1 = vector.load %arg5[%c0_1, %c0_2] : memref<8x1xf32, #tpu.memory_space<vmem>>, vector<8x1xf32>
    %c0_3 = arith.constant 0 : index
    %c0_4 = arith.constant 0 : index
    %2 = vector.load %arg0[%c0_3, %c0_4] : memref<4x546xf32, #tpu.memory_space<vmem>>, vector<4x512xf32>
    %c0_5 = arith.constant 0 : index
    %c0_6 = arith.constant 0 : index
    %3 = vector.load %arg1[%c0_5, %c0_6] : memref<9x512xf32, #tpu.memory_space<vmem>>, vector<1x512xf32>
    %4 = vector.broadcast %3 : vector<1x512xf32> to vector<4x512xf32>
    %5 = arith.mulf %2, %4 : vector<4x512xf32>
    %c0_7 = arith.constant 0 : index
    %c0_8 = arith.constant 0 : index
    %6 = vector.load %arg7[%c0_7, %c0_8] : memref<36x512xf32, #tpu.memory_space<vmem>>, vector<4x512xf32>
    tpu.vector_store %arg7[%c0_7, %c0_8], %5 {strides = array<i32>} : memref<36x512xf32, #tpu.memory_space<vmem>>, vector<4x512xf32>,
    %c0_9 = arith.constant 0 : index
    %c1 = arith.constant 1 : index
    %7 = vector.load %arg0[%c0_9, %c1] : memref<4x546xf32, #tpu.memory_space<vmem>>, vector<4x512xf32>
    %c1_10 = arith.constant 1 : index
    %c0_11 = arith.constant 0 : index
    %8 = vector.load %arg1[%c1_10, %c0_11] : memref<9x512xf32, #tpu.memory_space<vmem>>, vector<1x512xf32>
    %9 = vector.broadcast %8 : vector<1x512xf32> to vector<4x512xf32>
    %10 = arith.mulf %7, %9 : vector<4x512xf32>
    %c4 = arith.constant 4 : index
    %c0_12 = arith.constant 0 : index
    %11 = vector.load %arg7[%c4, %c0_12] : memref<36x512xf32, #tpu.memory_space<vmem>>, vector<4x512xf32>
    tpu.vector_store %arg7[%c4, %c0_12], %10 {strides = array<i32>} : memref<36x512xf32, #tpu.memory_space<vmem>>, vector<4x512xf32>,
    %c0_13 = arith.constant 0 : index
    %c2 = arith.constant 2 : index
    %12 = vector.load %arg0[%c0_13, %c2] : memref<4x546xf32, #tpu.memory_space<vmem>>, vector<4x512xf32>
    %c2_14 = arith.constant 2 : index
    %c0_15 = arith.constant 0 : index
    %13 = vector.load %arg1[%c2_14, %c0_15] : memref<9x512xf32, #tpu.memory_space<vmem>>, vector<1x512xf32>
    %14 = vector.broadcast %13 : vector<1x512xf32> to vector<4x512xf32>
    %15 = arith.mulf %12, %14 : vector<4x512xf32>
    %c8 = arith.constant 8 : index
    %c0_16 = arith.constant 0 : index
    %16 = vector.load %arg7[%c8, %c0_16] : memref<36x512xf32, #tpu.memory_space<vmem>>, vector<4x512xf32>
    tpu.vector_store %arg7[%c8, %c0_16], %15 {strides = array<i32>} : memref<36x512xf32, #tpu.memory_space<vmem>>, vector<4x512xf32>,
    %c0_17 = arith.constant 0 : index
    %c16 = arith.constant 16 : index
    %17 = vector.load %arg0[%c0_17, %c16] : memref<4x546xf32, #tpu.memory_space<vmem>>, vector<4x512xf32>
    %c3 = arith.constant 3 : index
    %c0_18 = arith.constant 0 : index
    %18 = vector.load %arg1[%c3, %c0_18] : memref<9x512xf32, #tpu.memory_space<vmem>>, vector<1x512xf32>
    %19 = vector.broadcast %18 : vector<1x512xf32> to vector<4x512xf32>
    %20 = arith.mulf %17, %19 : vector<4x512xf32>
    %c12 = arith.constant 12 : index
    %c0_19 = arith.constant 0 : index
    %21 = vector.load %arg7[%c12, %c0_19] : memref<36x512xf32, #tpu.memory_space<vmem>>, vector<4x512xf32>
    tpu.vector_store %arg7[%c12, %c0_19], %20 {strides = array<i32>} : memref<36x512xf32, #tpu.memory_space<vmem>>, vector<4x512xf32>,
    %c0_20 = arith.constant 0 : index
    %c17 = arith.constant 17 : index
    %22 = vector.load %arg0[%c0_20, %c17] : memref<4x546xf32, #tpu.memory_space<vmem>>, vector<4x512xf32>
    %c4_21 = arith.constant 4 : index
    %c0_22 = arith.constant 0 : index
    %23 = vector.load %arg1[%c4_21, %c0_22] : memref<9x512xf32, #tpu.memory_space<vmem>>, vector<1x512xf32>
    %24 = vector.broadcast %23 : vector<1x512xf32> to vector<4x512xf32>
    %25 = arith.mulf %22, %24 : vector<4x512xf32>
    %c16_23 = arith.constant 16 : index
    %c0_24 = arith.constant 0 : index
    %26 = vector.load %arg7[%c16_23, %c0_24] : memref<36x512xf32, #tpu.memory_space<vmem>>, vector<4x512xf32>
    tpu.vector_store %arg7[%c16_23, %c0_24], %25 {strides = array<i32>} : memref<36x512xf32, #tpu.memory_space<vmem>>, vector<4x512xf32>,
    %c0_25 = arith.constant 0 : index
    %c18 = arith.constant 18 : index
    %27 = vector.load %arg0[%c0_25, %c18] : memref<4x546xf32, #tpu.memory_space<vmem>>, vector<4x512xf32>
    %c5 = arith.constant 5 : index
    %c0_26 = arith.constant 0 : index
    %28 = vector.load %arg1[%c5, %c0_26] : memref<9x512xf32, #tpu.memory_space<vmem>>, vector<1x512xf32>
    %29 = vector.broadcast %28 : vector<1x512xf32> to vector<4x512xf32>
    %30 = arith.mulf %27, %29 : vector<4x512xf32>
    %c20 = arith.constant 20 : index
    %c0_27 = arith.constant 0 : index
    %31 = vector.load %arg7[%c20, %c0_27] : memref<36x512xf32, #tpu.memory_space<vmem>>, vector<4x512xf32>
    tpu.vector_store %arg7[%c20, %c0_27], %30 {strides = array<i32>} : memref<36x512xf32, #tpu.memory_space<vmem>>, vector<4x512xf32>,
    %c0_28 = arith.constant 0 : index
    %c32 = arith.constant 32 : index
    %32 = vector.load %arg0[%c0_28, %c32] : memref<4x546xf32, #tpu.memory_space<vmem>>, vector<4x512xf32>
    %c6 = arith.constant 6 : index
    %c0_29 = arith.constant 0 : index
    %33 = vector.load %arg1[%c6, %c0_29] : memref<9x512xf32, #tpu.memory_space<vmem>>, vector<1x512xf32>
    %34 = vector.broadcast %33 : vector<1x512xf32> to vector<4x512xf32>
    %35 = arith.mulf %32, %34 : vector<4x512xf32>
    %c24 = arith.constant 24 : index
    %c0_30 = arith.constant 0 : index
    %36 = vector.load %arg7[%c24, %c0_30] : memref<36x512xf32, #tpu.memory_space<vmem>>, vector<4x512xf32>
    tpu.vector_store %arg7[%c24, %c0_30], %35 {strides = array<i32>} : memref<36x512xf32, #tpu.memory_space<vmem>>, vector<4x512xf32>,
    %c0_31 = arith.constant 0 : index
    %c33 = arith.constant 33 : index
    %37 = vector.load %arg0[%c0_31, %c33] : memref<4x546xf32, #tpu.memory_space<vmem>>, vector<4x512xf32>
    %c7 = arith.constant 7 : index
    %c0_32 = arith.constant 0 : index
    %38 = vector.load %arg1[%c7, %c0_32] : memref<9x512xf32, #tpu.memory_space<vmem>>, vector<1x512xf32>
    %39 = vector.broadcast %38 : vector<1x512xf32> to vector<4x512xf32>
    %40 = arith.mulf %37, %39 : vector<4x512xf32>
    %c28 = arith.constant 28 : index
    %c0_33 = arith.constant 0 : index
    %41 = vector.load %arg7[%c28, %c0_33] : memref<36x512xf32, #tpu.memory_space<vmem>>, vector<4x512xf32>
    tpu.vector_store %arg7[%c28, %c0_33], %40 {strides = array<i32>} : memref<36x512xf32, #tpu.memory_space<vmem>>, vector<4x512xf32>,
    %c0_34 = arith.constant 0 : index
    %c34 = arith.constant 34 : index
    %42 = vector.load %arg0[%c0_34, %c34] : memref<4x546xf32, #tpu.memory_space<vmem>>, vector<4x512xf32>
    %c8_35 = arith.constant 8 : index
    %c0_36 = arith.constant 0 : index
    %43 = vector.load %arg1[%c8_35, %c0_36] : memref<9x512xf32, #tpu.memory_space<vmem>>, vector<1x512xf32>
    %44 = vector.broadcast %43 : vector<1x512xf32> to vector<4x512xf32>
    %45 = arith.mulf %42, %44 : vector<4x512xf32>
    %c32_37 = arith.constant 32 : index
    %c0_38 = arith.constant 0 : index
    %46 = vector.load %arg7[%c32_37, %c0_38] : memref<36x512xf32, #tpu.memory_space<vmem>>, vector<4x512xf32>
    tpu.vector_store %arg7[%c32_37, %c0_38], %45 {strides = array<i32>} : memref<36x512xf32, #tpu.memory_space<vmem>>, vector<4x512xf32>,
    %c0_39 = arith.constant 0 : index
    %c0_40 = arith.constant 0 : index
    %47 = vector.load %arg2[%c0_39, %c0_40] : memref<8x36xf32, #tpu.memory_space<vmem>>, vector<8x36xf32>
    %c0_41 = arith.constant 0 : index
    %c0_42 = arith.constant 0 : index
    %48 = vector.load %arg7[%c0_41, %c0_42] : memref<36x512xf32, #tpu.memory_space<vmem>>, vector<36x512xf32>
    %cst = arith.constant dense<0.000000e+00> : vector<8x512xf32>
    %49 = tpu.matmul %47, %48, %cst {dimension_numbers = #tpu.dot_dimension_numbers<[1], [0], [0], [1], [0, 0, 1, 1], [], []>} : vector<8x36xf32>, vector<36x512xf32>, vector<8x512xf32> -> vector<8x512xf32>
    %cst_43 = arith.constant dense<0.000000e+00> : vector<8xf32>
    %50 = vector.multi_reduction <add>, %49, %cst_43 [1] : vector<8x512xf32> to vector<8xf32>
    %51 = vector.shape_cast %50 : vector<8xf32> to vector<8x1xf32>
    %cst_44 = arith.constant 0.001953125 : f32
    %52 = vector.broadcast %cst_44 : f32 to vector<8x1xf32>
    %53 = arith.mulf %51, %52 : vector<8x1xf32>
    %54 = arith.mulf %49, %49 : vector<8x512xf32>
    %cst_45 = arith.constant dense<0.000000e+00> : vector<8xf32>
    %55 = vector.multi_reduction <add>, %54, %cst_45 [1] : vector<8x512xf32> to vector<8xf32>
    %56 = vector.shape_cast %55 : vector<8xf32> to vector<8x1xf32>
    %cst_46 = arith.constant 0.001953125 : f32
    %57 = vector.broadcast %cst_46 : f32 to vector<8x1xf32>
    %58 = arith.mulf %56, %57 : vector<8x1xf32>
    %59 = arith.mulf %53, %53 : vector<8x1xf32>
    %60 = arith.subf %58, %59 : vector<8x1xf32>
    %61 = vector.broadcast %53 : vector<8x1xf32> to vector<8x512xf32>
    %62 = arith.subf %49, %61 : vector<8x512xf32>
    %cst_47 = arith.constant 9.99999974E-6 : f32
    %63 = vector.broadcast %cst_47 : f32 to vector<8x1xf32>
    %64 = arith.addf %60, %63 : vector<8x1xf32>
    %65 = math.rsqrt %64 : vector<8x1xf32>
    %66 = arith.mulf %65, %0 : vector<8x1xf32>
    %67 = vector.broadcast %66 : vector<8x1xf32> to vector<8x512xf32>
    %68 = arith.mulf %62, %67 : vector<8x512xf32>
    %69 = vector.broadcast %1 : vector<8x1xf32> to vector<8x512xf32>
    %70 = arith.addf %68, %69 : vector<8x512xf32>
    %cst_48 = arith.constant 0.000000e+00 : f32
    %71 = vector.broadcast %cst_48 : f32 to vector<8x17xf32>
    %c0_49 = arith.constant 0 : index
    %c0_50 = arith.constant 0 : index
    %72 = vector.load %arg9[%c0_49, %c0_50] : memref<8x546xf32, #tpu.memory_space<vmem>>, vector<8x17xf32>
    tpu.vector_store %arg9[%c0_49, %c0_50], %71 {strides = array<i32>} : memref<8x546xf32, #tpu.memory_space<vmem>>, vector<8x17xf32>,
    %cst_51 = arith.constant 0.000000e+00 : f32
    %73 = vector.broadcast %cst_51 : f32 to vector<8x17xf32>
    %c0_52 = arith.constant 0 : index
    %c529 = arith.constant 529 : index
    %74 = vector.load %arg9[%c0_52, %c529] : memref<8x546xf32, #tpu.memory_space<vmem>>, vector<8x17xf32>
    tpu.vector_store %arg9[%c0_52, %c529], %73 {strides = array<i32>} : memref<8x546xf32, #tpu.memory_space<vmem>>, vector<8x17xf32>,
    %cst_53 = arith.constant 0.000000e+00 : f32
    %75 = vector.broadcast %cst_53 : f32 to vector<8x512xf32>
    %76 = arith.maximumf %70, %75 : vector<8x512xf32>
    %c0_54 = arith.constant 0 : index
    %c17_55 = arith.constant 17 : index
    %77 = vector.load %arg9[%c0_54, %c17_55] : memref<8x546xf32, #tpu.memory_space<vmem>>, vector<8x512xf32>
    tpu.vector_store %arg9[%c0_54, %c17_55], %76 {strides = array<i32>} : memref<8x546xf32, #tpu.memory_space<vmem>>, vector<8x512xf32>,
    %c0_56 = arith.constant 0 : index
    %c0_57 = arith.constant 0 : index
    %78 = vector.load %arg9[%c0_56, %c0_57] : memref<8x546xf32, #tpu.memory_space<vmem>>, vector<8x512xf32>
    %c0_58 = arith.constant 0 : index
    %c0_59 = arith.constant 0 : index
    %79 = vector.load %arg1[%c0_58, %c0_59] : memref<9x512xf32, #tpu.memory_space<vmem>>, vector<1x512xf32>
    %80 = vector.broadcast %79 : vector<1x512xf32> to vector<8x512xf32>
    %81 = arith.mulf %78, %80 : vector<8x512xf32>
    %c0_60 = arith.constant 0 : index
    %c0_61 = arith.constant 0 : index
    %82 = vector.load %arg8[%c0_60, %c0_61] : memref<72x512xf32, #tpu.memory_space<vmem>>, vector<8x512xf32>
    tpu.vector_store %arg8[%c0_60, %c0_61], %81 {strides = array<i32>} : memref<72x512xf32, #tpu.memory_space<vmem>>, vector<8x512xf32>,
    %c0_62 = arith.constant 0 : index
    %c1_63 = arith.constant 1 : index
    %83 = vector.load %arg9[%c0_62, %c1_63] : memref<8x546xf32, #tpu.memory_space<vmem>>, vector<8x512xf32>
    %c1_64 = arith.constant 1 : index
    %c0_65 = arith.constant 0 : index
    %84 = vector.load %arg1[%c1_64, %c0_65] : memref<9x512xf32, #tpu.memory_space<vmem>>, vector<1x512xf32>
    %85 = vector.broadcast %84 : vector<1x512xf32> to vector<8x512xf32>
    %86 = arith.mulf %83, %85 : vector<8x512xf32>
    %c8_66 = arith.constant 8 : index
    %c0_67 = arith.constant 0 : index
    %87 = vector.load %arg8[%c8_66, %c0_67] : memref<72x512xf32, #tpu.memory_space<vmem>>, vector<8x512xf32>
    tpu.vector_store %arg8[%c8_66, %c0_67], %86 {strides = array<i32>} : memref<72x512xf32, #tpu.memory_space<vmem>>, vector<8x512xf32>,
    %c0_68 = arith.constant 0 : index
    %c2_69 = arith.constant 2 : index
    %88 = vector.load %arg9[%c0_68, %c2_69] : memref<8x546xf32, #tpu.memory_space<vmem>>, vector<8x512xf32>
    %c2_70 = arith.constant 2 : index
    %c0_71 = arith.constant 0 : index
    %89 = vector.load %arg1[%c2_70, %c0_71] : memref<9x512xf32, #tpu.memory_space<vmem>>, vector<1x512xf32>
    %90 = vector.broadcast %89 : vector<1x512xf32> to vector<8x512xf32>
    %91 = arith.mulf %88, %90 : vector<8x512xf32>
    %c16_72 = arith.constant 16 : index
    %c0_73 = arith.constant 0 : index
    %92 = vector.load %arg8[%c16_72, %c0_73] : memref<72x512xf32, #tpu.memory_space<vmem>>, vector<8x512xf32>
    tpu.vector_store %arg8[%c16_72, %c0_73], %91 {strides = array<i32>} : memref<72x512xf32, #tpu.memory_space<vmem>>, vector<8x512xf32>,
    %c0_74 = arith.constant 0 : index
    %c16_75 = arith.constant 16 : index
    %93 = vector.load %arg9[%c0_74, %c16_75] : memref<8x546xf32, #tpu.memory_space<vmem>>, vector<8x512xf32>
    %c3_76 = arith.constant 3 : index
    %c0_77 = arith.constant 0 : index
    %94 = vector.load %arg1[%c3_76, %c0_77] : memref<9x512xf32, #tpu.memory_space<vmem>>, vector<1x512xf32>
    %95 = vector.broadcast %94 : vector<1x512xf32> to vector<8x512xf32>
    %96 = arith.mulf %93, %95 : vector<8x512xf32>
    %c24_78 = arith.constant 24 : index
    %c0_79 = arith.constant 0 : index
    %97 = vector.load %arg8[%c24_78, %c0_79] : memref<72x512xf32, #tpu.memory_space<vmem>>, vector<8x512xf32>
    tpu.vector_store %arg8[%c24_78, %c0_79], %96 {strides = array<i32>} : memref<72x512xf32, #tpu.memory_space<vmem>>, vector<8x512xf32>,
    %c0_80 = arith.constant 0 : index
    %c17_81 = arith.constant 17 : index
    %98 = vector.load %arg9[%c0_80, %c17_81] : memref<8x546xf32, #tpu.memory_space<vmem>>, vector<8x512xf32>
    %c4_82 = arith.constant 4 : index
    %c0_83 = arith.constant 0 : index
    %99 = vector.load %arg1[%c4_82, %c0_83] : memref<9x512xf32, #tpu.memory_space<vmem>>, vector<1x512xf32>
    %100 = vector.broadcast %99 : vector<1x512xf32> to vector<8x512xf32>
    %101 = arith.mulf %98, %100 : vector<8x512xf32>
    %c32_84 = arith.constant 32 : index
    %c0_85 = arith.constant 0 : index
    %102 = vector.load %arg8[%c32_84, %c0_85] : memref<72x512xf32, #tpu.memory_space<vmem>>, vector<8x512xf32>
    tpu.vector_store %arg8[%c32_84, %c0_85], %101 {strides = array<i32>} : memref<72x512xf32, #tpu.memory_space<vmem>>, vector<8x512xf32>,
    %c0_86 = arith.constant 0 : index
    %c18_87 = arith.constant 18 : index
    %103 = vector.load %arg9[%c0_86, %c18_87] : memref<8x546xf32, #tpu.memory_space<vmem>>, vector<8x512xf32>
    %c5_88 = arith.constant 5 : index
    %c0_89 = arith.constant 0 : index
    %104 = vector.load %arg1[%c5_88, %c0_89] : memref<9x512xf32, #tpu.memory_space<vmem>>, vector<1x512xf32>
    %105 = vector.broadcast %104 : vector<1x512xf32> to vector<8x512xf32>
    %106 = arith.mulf %103, %105 : vector<8x512xf32>
    %c40 = arith.constant 40 : index
    %c0_90 = arith.constant 0 : index
    %107 = vector.load %arg8[%c40, %c0_90] : memref<72x512xf32, #tpu.memory_space<vmem>>, vector<8x512xf32>
    tpu.vector_store %arg8[%c40, %c0_90], %106 {strides = array<i32>} : memref<72x512xf32, #tpu.memory_space<vmem>>, vector<8x512xf32>,
    %c0_91 = arith.constant 0 : index
    %c32_92 = arith.constant 32 : index
    %108 = vector.load %arg9[%c0_91, %c32_92] : memref<8x546xf32, #tpu.memory_space<vmem>>, vector<8x512xf32>
    %c6_93 = arith.constant 6 : index
    %c0_94 = arith.constant 0 : index
    %109 = vector.load %arg1[%c6_93, %c0_94] : memref<9x512xf32, #tpu.memory_space<vmem>>, vector<1x512xf32>
    %110 = vector.broadcast %109 : vector<1x512xf32> to vector<8x512xf32>
    %111 = arith.mulf %108, %110 : vector<8x512xf32>
    %c48 = arith.constant 48 : index
    %c0_95 = arith.constant 0 : index
    %112 = vector.load %arg8[%c48, %c0_95] : memref<72x512xf32, #tpu.memory_space<vmem>>, vector<8x512xf32>
    tpu.vector_store %arg8[%c48, %c0_95], %111 {strides = array<i32>} : memref<72x512xf32, #tpu.memory_space<vmem>>, vector<8x512xf32>,
    %c0_96 = arith.constant 0 : index
    %c33_97 = arith.constant 33 : index
    %113 = vector.load %arg9[%c0_96, %c33_97] : memref<8x546xf32, #tpu.memory_space<vmem>>, vector<8x512xf32>
    %c7_98 = arith.constant 7 : index
    %c0_99 = arith.constant 0 : index
    %114 = vector.load %arg1[%c7_98, %c0_99] : memref<9x512xf32, #tpu.memory_space<vmem>>, vector<1x512xf32>
    %115 = vector.broadcast %114 : vector<1x512xf32> to vector<8x512xf32>
    %116 = arith.mulf %113, %115 : vector<8x512xf32>
    %c56 = arith.constant 56 : index
    %c0_100 = arith.constant 0 : index
    %117 = vector.load %arg8[%c56, %c0_100] : memref<72x512xf32, #tpu.memory_space<vmem>>, vector<8x512xf32>
    tpu.vector_store %arg8[%c56, %c0_100], %116 {strides = array<i32>} : memref<72x512xf32, #tpu.memory_space<vmem>>, vector<8x512xf32>,
    %c0_101 = arith.constant 0 : index
    %c34_102 = arith.constant 34 : index
    %118 = vector.load %arg9[%c0_101, %c34_102] : memref<8x546xf32, #tpu.memory_space<vmem>>, vector<8x512xf32>
    %c8_103 = arith.constant 8 : index
    %c0_104 = arith.constant 0 : index
    %119 = vector.load %arg1[%c8_103, %c0_104] : memref<9x512xf32, #tpu.memory_space<vmem>>, vector<1x512xf32>
    %120 = vector.broadcast %119 : vector<1x512xf32> to vector<8x512xf32>
    %121 = arith.mulf %118, %120 : vector<8x512xf32>
    %c64 = arith.constant 64 : index
    %c0_105 = arith.constant 0 : index
    %122 = vector.load %arg8[%c64, %c0_105] : memref<72x512xf32, #tpu.memory_space<vmem>>, vector<8x512xf32>
    tpu.vector_store %arg8[%c64, %c0_105], %121 {strides = array<i32>} : memref<72x512xf32, #tpu.memory_space<vmem>>, vector<8x512xf32>,
    %c0_106 = arith.constant 0 : index
    %c0_107 = arith.constant 0 : index
    %123 = vector.load %arg3[%c0_106, %c0_107] : memref<8x72xf32, #tpu.memory_space<vmem>>, vector<8x72xf32>
    %c0_108 = arith.constant 0 : index
    %c0_109 = arith.constant 0 : index
    %124 = vector.load %arg8[%c0_108, %c0_109] : memref<72x512xf32, #tpu.memory_space<vmem>>, vector<72x512xf32>
    %cst_110 = arith.constant dense<0.000000e+00> : vector<8x512xf32>
    %125 = tpu.matmul %123, %124, %cst_110 {dimension_numbers = #tpu.dot_dimension_numbers<[1], [0], [0], [1], [0, 0, 1, 1], [], []>} : vector<8x72xf32>, vector<72x512xf32>, vector<8x512xf32> -> vector<8x512xf32>
    %cst_111 = arith.constant dense<0.000000e+00> : vector<8xf32>
    %126 = vector.multi_reduction <add>, %125, %cst_111 [1] : vector<8x512xf32> to vector<8xf32>
    %127 = vector.shape_cast %126 : vector<8xf32> to vector<8x1xf32>
    %cst_112 = arith.constant 0.001953125 : f32
    %128 = vector.broadcast %cst_112 : f32 to vector<8x1xf32>
    %129 = arith.mulf %127, %128 : vector<8x1xf32>
    %130 = arith.mulf %125, %125 : vector<8x512xf32>
    %cst_113 = arith.constant dense<0.000000e+00> : vector<8xf32>
    %131 = vector.multi_reduction <add>, %130, %cst_113 [1] : vector<8x512xf32> to vector<8xf32>
    %132 = vector.shape_cast %131 : vector<8xf32> to vector<8x1xf32>
    %cst_114 = arith.constant 0.001953125 : f32
    %133 = vector.broadcast %cst_114 : f32 to vector<8x1xf32>
    %134 = arith.mulf %132, %133 : vector<8x1xf32>
    %135 = arith.mulf %129, %129 : vector<8x1xf32>
    %136 = arith.subf %134, %135 : vector<8x1xf32>
    %137 = vector.broadcast %129 : vector<8x1xf32> to vector<8x512xf32>
    %138 = arith.subf %125, %137 : vector<8x512xf32>
    %cst_115 = arith.constant 9.99999974E-6 : f32
    %139 = vector.broadcast %cst_115 : f32 to vector<8x1xf32>
    %140 = arith.addf %136, %139 : vector<8x1xf32>
    %141 = math.rsqrt %140 : vector<8x1xf32>
    %142 = arith.mulf %141, %0 : vector<8x1xf32>
    %143 = vector.broadcast %142 : vector<8x1xf32> to vector<8x512xf32>
    %144 = arith.mulf %138, %143 : vector<8x512xf32>
    %145 = vector.broadcast %1 : vector<8x1xf32> to vector<8x512xf32>
    %146 = arith.addf %144, %145 : vector<8x512xf32>
    %147 = arith.addf %70, %146 : vector<8x512xf32>
    %cst_116 = arith.constant 0.000000e+00 : f32
    %148 = vector.broadcast %cst_116 : f32 to vector<8x512xf32>
    %149 = arith.maximumf %147, %148 : vector<8x512xf32>
    %c0_117 = arith.constant 0 : index
    %c0_118 = arith.constant 0 : index
    %150 = vector.load %arg6[%c0_117, %c0_118] : memref<8x512xf32, #tpu.memory_space<vmem>>, vector<8x512xf32>
    tpu.vector_store %arg6[%c0_117, %c0_118], %149 {strides = array<i32>} : memref<8x512xf32, #tpu.memory_space<vmem>>, vector<8x512xf32>,
    return
  }
}

</mosaic_0001>

<bundles_post_ra>
// kernel: tpu_custom_call.1
= control target key start
LH: loop header
LB: loop body
LE: loop exit
PB: predicated region body
PF: predicated region fallthrough
CT: control target
= control target key end

     0   :  { %11 = vsyncpa [#allocation6], 0  ;;  %s2789_s0 = inlined_call_operand.hbm [shape: f32[4,546], index: 0, kind: input, shape index: {}]   ;;  %s2790_s1 = inlined_call_operand.hbm [shape: f32[9,512], index: 1, kind: input, shape index: {}]   ;;  %s2791_s2 = inlined_call_operand.vmem [shape: f32[8,36], index: 2, kind: input, shape index: {}]   ;;  %s2792_s3 = inlined_call_operand.vmem [shape: f32[8,72], index: 3, kind: input, shape index: {}]   ;;  %s2793_s4 = inlined_call_operand.vmem [shape: f32[8,1], index: 4, kind: input, shape index: {}]   ;;  %s2794_s5 = inlined_call_operand.vmem [shape: f32[8,1], index: 5, kind: input, shape index: {}]   ;;  %s2795_s6 = inlined_call_operand.hbm [shape: f32[8,512], index: 6, kind: output, shape index: {}]  }
   0x1   :  { %12 = vsyncpa [#allocation9], 0 }
   0x2   :  { %13 = vsyncpa [#allocation7], 0  ;;  %s1969_s21 = smov [#allocation5]   ;;  %s1970_s23 = smov [#allocation8]  }
   0x3   :  { %s20_s22 = sshll.u32 %s1969_s21, 4  ;;  %s29_s24 = sshll.u32 %s1970_s23, 4  ;;  %s21_s22 = int_to_ptr.vmem [resolvable:$true] %s20_s22  ;;  %s2026_s24 = int_to_ptr.vmem [resolvable:$true] %s29_s24 }
   0x4   :  { %s1897_s27 = scalar_lea.hbm %s2789_s0, 320 }
   0x5   :  { %p1898_p0 = scmp.ne.s32.totalorder %s2789_s0, %s1897_s27  ;;  %p1901_p1 = scmp.lt.u32.totalorder %s1897_s27, %s2789_s0 }
   0x7   :  { %p1903_p2 = pnand %p1901_p1, %p1898_p0 }
   0x9   :  { %1906 = shalt.err (!%p1903_p2)
}
   0xa   :  { %s1907_s8 = scalar_lea.vmem %s21_s22, 320  ;;  %p1912_p4 = scmp.lt.s32.totalorder %s21_s22, %s21_s22 }
   0xb   :  { %p1908_p3 = scmp.ne.s32.totalorder %s21_s22, %s1907_s8  ;;  %p1913_p5 = scmp.lt.s32.totalorder %s1907_s8, %s1907_s8 }
   0xd   :  { %p1914_p6 = por %p1913_p5, %p1912_p4 }
   0xf   :  { %p1915_p7 = pnand %p1914_p6, %p1908_p3 }
  0x11   :  { %1918 = shalt.err (!%p1915_p7)
}
  0x12   :  { %23 = dma.hbm_to_vmem [thread:$0]  %s2789_s0, 320, %s21_s22, [#allocation6]  }
  0x13   :  { %s1919_s13 = scalar_lea.hbm %s2790_s1, 1024 }
  0x14   :  { %p1920_p8 = scmp.ne.s32.totalorder %s2790_s1, %s1919_s13  ;;  %p1923_p9 = scmp.lt.u32.totalorder %s1919_s13, %s2790_s1 }
  0x16   :  { %p1925_p10 = pnand %p1923_p9, %p1920_p8 }
  0x18   :  { %1928 = shalt.err (!%p1925_p10)
}
  0x19   :  { %s1929_s18 = scalar_lea.vmem %s2026_s24, 1024  ;;  %p1934_p12 = scmp.lt.s32.totalorder %s2026_s24, %s2026_s24 }
  0x1a   :  { %p1930_p11 = scmp.ne.s32.totalorder %s2026_s24, %s1929_s18  ;;  %p1935_p13 = scmp.lt.s32.totalorder %s1929_s18, %s1929_s18 }
  0x1c   :  { %p1936_p0 = por %p1935_p13, %p1934_p12 }
  0x1e   :  { %p1937_p1 = pnand %p1936_p0, %p1930_p11 }
  0x20   :  { %1940 = shalt.err (!%p1937_p1)
}
  0x21   :  { %s1971_s0 = smov 512   ;;  %s1972_s19 = smov 32  }
  0x22   :  { %35 = dma.hbm_to_vmem [thread:$0]  %s2790_s1, 1024, %s2026_s24, [#allocation9], %s1971_s0, %s1971_s0, %s1972_s19  }
  0x23   :  { %1963 = dma.done.wait [#allocation6], 320  }
  0x24   :  { %1964 = vsyncadd [#allocation6], 4294966976 }
  0x25   :  { %1965 = dma.done.wait [#allocation9], 1024  }
  0x26   :  { %1966 = vsyncadd [#allocation9], 4294966272  ;;  %v56_v0 = vlaneseq  ;;  %v230_v6 = vld [vmem:[#allocation8 + $0x3] ss:$8 sm:$0xf]  ;;  %s1973_s1 = smov 16  }
  0x27   :  { %v92_v7 = vld [vmem:[#allocation8 + $0x1] ss:$8 sm:$0xf]  ;;  %v162_v12 = vld [vmem:[#allocation8 + $0x2] ss:$8 sm:$0xf] }
  0x28   :  { %v57_v1 = vshrl.u32 %v56_v0, 7  ;;  %s1974_s22 = smov 1   ;;  %v367_v25 = vld [vmem:[#allocation8 + $0x5] ss:$8 sm:$0xf]  ;;  %s1975_s23 = smov 2  }
  0x29   :  { %v504_v32 = vld [vmem:[#allocation8 + $0x7] ss:$8 sm:$0xf]  ;;  %v436_v39 = vld [vmem:[#allocation8 + $0x6] ss:$8 sm:$0xf] }
  0x2a   :  { %v2058_v2 = vsub.s32 0, %v57_v1  ;;  %v2060_v3 = vsub.s32 1, %v57_v1  ;;  %v2062_v4 = vsub.s32 2, %v57_v1  ;;  %v2064_v5 = vsub.s32 3, %v57_v1  ;;  %s1976_s24 = smov 18   ;;  %s1977_s25 = smov 33  }
  0x2b   :  { %v299_v40 = vld [vmem:[#allocation8 + $0x4] ss:$8 sm:$0xf]  ;;  %v573_v53 = vld [vmem:[#allocation8 + $0x20] ss:$8 sm:$0xf] }
  0x2c   :  { %v235_v8 = vrot.slane %v230_v6, %v2058_v2  ;;  %v239_v9 = vrot.slane %v230_v6, %v2060_v3  ;;  %v97_v10 = vrot.slane %v92_v7, %v2058_v2  ;;  %v101_v11 = vrot.slane %v92_v7, %v2060_v3  ;;  %s1978_s26 = smov 17   ;;  %s1979_s27 = smov 34  }
  0x2d   :  { %v243_v13 = vrot.slane %v230_v6, %v2062_v4  ;;  %v247_v14 = vrot.slane %v230_v6, %v2064_v5  ;;  %v105_v15 = vrot.slane %v92_v7, %v2062_v4  ;;  %v109_v16 = vrot.slane %v92_v7, %v2064_v5  ;;  %s1980_s28 = smov 126   ;;  %s1981_s29 = smov 110  }
  0x2e   :  { %v248_v17 = vcombine.low %v235_v8, %v239_v9  ;;  %v110_v18 = vcombine.low %v97_v10, %v101_v11  ;;  %v175_v20 = vrot.slane %v162_v12, %v2062_v4  ;;  %v179_v21 = vrot.slane %v162_v12, %v2064_v5  ;;  %v160_v8 = vld [vmem:[#allocation5 + $0x10] sm:$0xf]  ;;  %s1982_s30 = smov 95   ;;  %s1983_s7 = smov 111  }
  0x2f   :  { %v249_v19 = vcombine.low %v243_v13, %v247_v14  ;;  %v111_v22 = vcombine.low %v105_v15, %v109_v16  ;;  %v167_v23 = vrot.slane %v162_v12, %v2058_v2  ;;  %v171_v24 = vrot.slane %v162_v12, %v2060_v3  ;;  %v2123_v12 = vld [vmem:[#allocation5] sm:$0xff]  ;;  %s1984_s8 = smov 96   ;;  %s1985_s9 = smov 127  }
  0x30   :  { %250 = vrot.lane.b32.xlu1 %v248_v17, %s1973_s1  ;;  %112 = vrot.lane.b32.xlu0 %v110_v18, %s1974_s22  ;;  %v181_v26 = vcombine.low %v175_v20, %v179_v21  ;;  %v380_v27 = vrot.slane %v367_v25, %v2062_v4  ;;  %v384_v28 = vrot.slane %v367_v25, %v2064_v5  ;;  %vm188_vm0 = vcmask 15360   ;;  %s1986_s10 = smov 112   ;;  %s1987_s11 = smov 94  }
  0x31   :  { %v180_v29 = vcombine.low %v167_v23, %v171_v24  ;;  %v372_v30 = vrot.slane %v367_v25, %v2058_v2  ;;  %v376_v31 = vrot.slane %v367_v25, %v2060_v3  ;;  %v517_v34 = vrot.slane %v504_v32, %v2062_v4 }
  0x32   :  { %v386_v33 = vcombine.low %v380_v27, %v384_v28  ;;  %v521_v35 = vrot.slane %v504_v32, %v2064_v5  ;;  %v509_v37 = vrot.slane %v504_v32, %v2058_v2  ;;  %v513_v38 = vrot.slane %v504_v32, %v2060_v3 }
  0x33   :  { %v385_v36 = vcombine.low %v372_v30, %v376_v31  ;;  %v441_v41 = vrot.slane %v436_v39, %v2058_v2  ;;  %v445_v42 = vrot.slane %v436_v39, %v2060_v3  ;;  %v304_v43 = vrot.slane %v299_v40, %v2058_v2 }
  0x34   :  { %252 = vrot.lane.b32.xlu1 %v249_v19, %s1973_s1  ;;  %114 = vrot.lane.b32.xlu0 %v111_v22, %s1974_s22  ;;  %v523_v44 = vcombine.low %v517_v34, %v521_v35  ;;  %v522_v45 = vcombine.low %v509_v37, %v513_v38  ;;  %v308_v46 = vrot.slane %v299_v40, %v2060_v3  ;;  %vm393_vm1 = vcmask 146432   ;;  %v434_v38 = vld [vmem:[#allocation5 + $0x10] sm:$0xf] }
  0x35   :  { %v454_v47 = vcombine.low %v441_v41, %v445_v42  ;;  %v449_v48 = vrot.slane %v436_v39, %v2062_v4  ;;  %v453_v49 = vrot.slane %v436_v39, %v2064_v5  ;;  %v312_v51 = vrot.slane %v299_v40, %v2062_v4 }
  0x36   :  { %v317_v50 = vcombine.low %v304_v43, %v308_v46  ;;  %v316_v52 = vrot.slane %v299_v40, %v2064_v5  ;;  %v578_v55 = vrot.slane %v573_v53, %v2058_v2  ;;  %v582_v56 = vrot.slane %v573_v53, %v2060_v3 }
  0x37   :  { %v455_v54 = vcombine.low %v449_v48, %v453_v49  ;;  %v586_v58 = vrot.slane %v573_v53, %v2062_v4  ;;  %v590_v59 = vrot.slane %v573_v53, %v2064_v5  ;;  %vm530_vm2 = vcmask 269312   ;;  %v2197_v48 = vld [vmem:[#allocation5 + $0x8] sm:$0xff] }
  0x38   :  { %184 = vrot.lane.b32.xlu1 %v181_v26, %s1975_s23  ;;  %182 = vrot.lane.b32.xlu0 %v180_v29, %s1975_s23  ;;  %v318_v57 = vcombine.low %v312_v51, %v316_v52  ;;  %v591_v60 = vcombine.low %v578_v55, %v582_v56  ;;  %vm325_vm3 = vcmask 138240   ;;  %vm462_vm4 = vcmask 261120  }
  0x39   :  { %v592_v61 = vcombine.low %v586_v58, %v590_v59  ;;  %vm120_vm5 = vcmask 1043456   ;;  %vm118_vm6 = vcmask 7168   ;;  %vm256_vm7 = vcmask 130048  }
  0x3a   :  { %vm599_vm8 = vcmask 277504   ;;  %vm145_vm9 = vcmask 1039360   ;;  %vm282_vm10 = vcmask 916480   ;;  %vm2796_vm11 = vcmask 908288  }
  0x3b   :  { %vm2797_vm12 = vcmask 785408   ;;  %vm419_vm13 = vcmask 900096   ;;  %vm213_vm14 = vcmask 1031168   ;;  %vm556_vm15 = vcmask 777216  }
  0x3c   :  { %389 = vrot.lane.b32.xlu1 %v386_v33, %s1976_s24  ;;  %387 = vrot.lane.b32.xlu0 %v385_v36, %s1976_s24  ;;  %v297_v33 = vld [vmem:[#allocation5 + $0x10] sm:$0xf]  ;;  %v2181_v36 = vld [vmem:[#allocation8] ss:$8 sm:$0xf] }
  0x3d   :  { %v67_v40 = vrot.slane %v2181_v36, %v2062_v4  ;;  %v71_v41 = vrot.slane %v2181_v36, %v2064_v5 }
  0x3f   :  { %v73_v46 = vcombine.low %v67_v40, %v71_v41 }
  0x40   :  { %526 = vrot.lane.b32.xlu1 %v523_v44, %s1977_s25  ;;  %524 = vrot.lane.b32.xlu0 %v522_v45, %s1977_s25 }
  0x41   :  { %v77_v52 = vmul.f32 %v2197_v48, %v73_v46 }
  0x43   :  { %v81_v56 = vcombine.high %v77_v52, %v77_v52  ;;  %86 = vst [vmem:[#allocation2 + $0x10] sm:$0xf] %v77_v52 }
  0x44   :  { %456 = vrot.lane.b32.xlu1 %v454_v47, %s1972_s19  ;;  %319 = vrot.lane.b32.xlu0 %v317_v50, %s1978_s26 }
  0x45   :  { %87 = vst [vmem:[#allocation2 + $0x18] sm:$0xf] %v81_v56  ;;  %v571_v56 = vld [vmem:[#allocation5 + $0x10] sm:$0xf] }
  0x48   :  { %458 = vrot.lane.b32.xlu1 %v455_v54, %s1972_s19  ;;  %321 = vrot.lane.b32.xlu0 %v318_v57, %s1978_s26 }
  0x4c   :  { %593 = vrot.lane.b32.xlu0 %v591_v60, %s1979_s27  ;;  %595 = vrot.lane.b32.xlu1 %v592_v61, %s1979_s27 }
  0xa2   :  { %v2114_v62 = vpop.permute.xlu1 %250  ;;  %v2116_v63 = vpop.permute.xlu0 %112 }
  0xa3   :  { %v116_v44 = vrot.slane %v2116_v63, 4  ;;  %v254_v53 = vrot.slane %v2114_v62, 4 }
  0xa5   :  { %v119_v54 = vsel %vm118_vm6, %v116_v44, %v2116_v63  ;;  %v257_v61 = vsel %vm256_vm7, %v254_v53, %v2114_v62 }
  0xa6   :  { %v2118_v0 = vpop.permute.xlu1 %252  ;;  %v2120_v1 = vpop.permute.xlu0 %114  ;;  %v2219_v60 = vmul.f32 %v2123_v12, %v119_v54  ;;  %v263_v62 = vmul.f32 %v257_v61, %v2123_v12 }
  0xa7   :  { %v117_v37 = vrot.slane %v2120_v1, 4  ;;  %v255_v50 = vrot.slane %v2118_v0, 4 }
  0xa9   :  { %v121_v51 = vsel %vm120_vm5, %v116_v44, %v117_v37  ;;  %v258_v58 = vsel %vm120_vm5, %v254_v53, %v255_v50 }
  0xaa   :  { %v185_v6 = vpop.permute.xlu1 %184  ;;  %v183_v7 = vpop.permute.xlu0 %182  ;;  %v122_v57 = vsel %vm118_vm6, %v121_v51, %v2120_v1  ;;  %v259_v1 = vsel %vm256_vm7, %v258_v58, %v2118_v0  ;;  %v502_v58 = vld [vmem:[#allocation5 + $0x10] sm:$0xf] }
  0xab   :  { %v187_v9 = vrot.slane %v185_v6, 4  ;;  %v186_v10 = vrot.slane %v183_v7, 4  ;;  %v127_v63 = vmul.f32 %v2197_v48, %v122_v57 }
  0xad   :  { %v189_v11 = vsel %vm188_vm0, %v186_v10, %v183_v7  ;;  %v197_v13 = vmul.f32 %v187_v9, %v160_v8  ;;  %v190_v39 = vsel %vm120_vm5, %v186_v10, %v187_v9  ;;  %v264_v10 = vmul.f32 %v259_v1, %v2197_v48 }
  0xae   :  { %v2125_v14 = vpop.permute.xlu1 %389  ;;  %v2127_v15 = vpop.permute.xlu0 %387  ;;  %v2130_v16 = vmul.f32 %v189_v11, %v2123_v12  ;;  %v191_v49 = vsel %vm188_vm0, %v190_v39, %v185_v6  ;;  %v90_v6 = vld [vmem:[#allocation5 + $0x10] sm:$0xf]  ;;  %v1988_v1 = vmov 0.0  }
  0xaf   :  { %v391_v17 = vrot.slane %v2127_v15, 4  ;;  %211 = vrot.lane.b32.xlu0 %v197_v13, %s1980_s28  ;;  %v2209_v55 = vmul.f32 %v191_v49, %v2197_v48  ;;  %v392_v59 = vrot.slane %v2125_v14, 4  ;;  %v128_v9 = vmul.f32 %v117_v37, %v90_v6  ;;  %v228_v11 = vld [vmem:[#allocation5 + $0x10] sm:$0xf]  ;;  %738 = vmatprep.mubr.f32.mxu0 %v1988_v1  ;;  %859 = vst.msk [vmem:[#allocation4] sm:$0xff] %vm325_vm3, %v1988_v1 }
  0xb0   :  { %203 = vrot.lane.b32.xlu1 %v2130_v16, %s1980_s28  ;;  %v365_v39 = vld [vmem:[#allocation5 + $0x10] sm:$0xf]  ;;  %v270_v46 = vcombine.low %v264_v10, %v264_v10  ;;  %809 = vmatprep.mubr.f32.mxu1 %v1988_v1 }
  0xb1   :  { %v394_v18 = vsel %vm393_vm1, %v391_v17, %v2127_v15  ;;  %v395_v8 = vsel %vm120_vm5, %v391_v17, %v392_v59  ;;  %v134_v15 = vcombine.low %v128_v9, %v128_v9  ;;  %v265_v17 = vmul.f32 %v255_v50, %v228_v11 }
  0xb2   :  { %v2140_v19 = vpop.permute.xlu1 %526  ;;  %v2142_v20 = vpop.permute.xlu0 %524  ;;  %v2145_v21 = vmul.f32 %v394_v18, %v2123_v12  ;;  %v396_v0 = vsel %vm393_vm1, %v395_v8, %v2125_v14  ;;  %v59_v18 = vrot.slane %v2181_v36, %v2058_v2  ;;  %v202_v49 = vcombine.high %v2209_v55, %v2209_v55 }
  0xb3   :  { %v528_v22 = vrot.slane %v2142_v20, 4  ;;  %v529_v7 = vrot.slane %v2140_v19, 4  ;;  %v269_v50 = vcombine.low %v263_v62, %v263_v62 }
  0xb4   :  { %411 = vrot.lane.b32.xlu1 %v2145_v21, %s1981_s29 }
  0xb5   :  { %v531_v23 = vsel %vm530_vm2, %v528_v22, %v2142_v20  ;;  %v532_v13 = vsel %vm120_vm5, %v528_v22, %v529_v7 }
  0xb6   :  { %v2154_v24 = vpop.permute.xlu1 %456  ;;  %v2156_v25 = vpop.permute.xlu0 %319  ;;  %v2159_v26 = vmul.f32 %v531_v23, %v2123_v12  ;;  %v63_v23 = vrot.slane %v2181_v36, %v2060_v3  ;;  %v533_v20 = vsel %vm530_vm2, %v532_v13, %v2140_v19 }
  0xb7   :  { %v460_v27 = vrot.slane %v2154_v24, 4  ;;  %v323_v28 = vrot.slane %v2156_v25, 4  ;;  %v538_v37 = vmul.f32 %v533_v20, %v2197_v48 }
  0xb8   :  { %548 = vrot.lane.b32.xlu1 %v2159_v26, %s1982_s30  ;;  %v72_v22 = vcombine.low %v59_v18, %v63_v23  ;;  %v543_v52 = vcombine.low %v2159_v26, %v2159_v26 }
  0xb9   :  { %v326_v29 = vsel %vm325_vm3, %v323_v28, %v2156_v25  ;;  %v463_v34 = vsel %vm462_vm4, %v460_v27, %v2154_v24 }
  0xba   :  { %v2169_v30 = vpop.permute.xlu1 %458  ;;  %v2171_v31 = vpop.permute.xlu0 %321  ;;  %v2174_v32 = vmul.f32 %v326_v29, %v2123_v12  ;;  %v2194_v45 = vmul.f32 %v463_v34, %v2123_v12  ;;  %v401_v29 = vmul.f32 %v396_v0, %v2197_v48  ;;  %v76_v34 = vmul.f32 %v2123_v12, %v72_v22 }
  0xbb   :  { %v324_v35 = vrot.slane %v2171_v31, 4  ;;  %v461_v42 = vrot.slane %v2169_v30, 4 }
  0xbc   :  { %340 = vrot.lane.b32.xlu1 %v2174_v32, %s1983_s7  ;;  %84 = vst [vmem:[#allocation2] sm:$0xf] %v76_v34  ;;  %v475_v40 = vcombine.high %v2194_v45, %v2194_v45 }
  0xbd   :  { %v334_v43 = vmul.f32 %v324_v35, %v297_v33  ;;  %v471_v47 = vmul.f32 %v461_v42, %v434_v38  ;;  %v327_v14 = vsel %vm120_vm5, %v323_v28, %v324_v35  ;;  %v271_v33 = vcombine.low %v265_v17, %v265_v17 }
  0xbe   :  { %v328_v36 = vsel %vm325_vm3, %v327_v14, %v2171_v31  ;;  %v464_v25 = vsel %vm120_vm5, %v460_v27, %v461_v42  ;;  %v80_v28 = vcombine.high %v76_v34, %v76_v34  ;;  %v338_v31 = vcombine.high %v2174_v32, %v2174_v32  ;;  %v594_v41 = vpop.permute.xlu0 %593  ;;  %v596_v54 = vpop.permute.xlu1 %595 }
  0xbf   :  { %348 = vrot.lane.b32.xlu0 %v334_v43, %s1983_s7  ;;  %v333_v35 = vmul.f32 %v328_v36, %v2197_v48  ;;  %v465_v38 = vsel %vm462_vm4, %v464_v25, %v2169_v30  ;;  %v402_v27 = vmul.f32 %v392_v59, %v365_v39  ;;  %v597_v42 = vrot.slane %v594_v41, 4 }
  0xc0   :  { %477 = vrot.lane.b32.xlu1 %v2194_v45, %s1984_s8  ;;  %85 = vst [vmem:[#allocation2 + $0x8] sm:$0xf] %v80_v28  ;;  %v470_v24 = vmul.f32 %v465_v38, %v2197_v48  ;;  %v133_v43 = vcombine.low %v127_v63, %v127_v63  ;;  %v201_v32 = vcombine.high %v2130_v16, %v2130_v16  ;;  %v598_v57 = vrot.slane %v596_v54, 4 }
  0xc1   :  { %v408_v30 = vcombine.low %v402_v27, %v402_v27  ;;  %v600_v44 = vsel %vm599_vm8, %v597_v42, %v594_v41  ;;  %v339_v51 = vcombine.high %v333_v35, %v333_v35  ;;  %v544_v59 = vcombine.low %v538_v37, %v538_v37 }
  0xc2   :  { %v606_v45 = vmul.f32 %v600_v44, %v2123_v12  ;;  %v406_v12 = vcombine.low %v2145_v21, %v2145_v21  ;;  %v476_v53 = vcombine.high %v470_v24, %v470_v24  ;;  %v608_v21 = vmul.f32 %v598_v57, %v571_v56 }
  0xc3   :  { %485 = vrot.lane.b32.xlu0 %v471_v47, %s1984_s8  ;;  %v132_v47 = vcombine.low %v2219_v60, %v2219_v60  ;;  %v601_v26 = vsel %vm120_vm5, %v597_v42, %v598_v57 }
  0xc4   :  { %207 = vrot.lane.b32.xlu1 %v2209_v55, %s1980_s28  ;;  %v612_v16 = vcombine.high %v606_v45, %v606_v45  ;;  %v407_v55 = vcombine.low %v401_v29, %v401_v29 }
  0xc7   :  { %137 = vrot.lane.b32.xlu0 %v2219_v60, %s1985_s9  ;;  %v539_v60 = vmul.f32 %v529_v7, %v502_v58 }
  0xc8   :  { %141 = vrot.lane.b32.xlu1 %v127_v63, %s1985_s9  ;;  %v602_v63 = vsel %vm599_vm8, %v601_v26, %v596_v54 }
  0xc9   :  { %v545_v61 = vcombine.low %v539_v60, %v539_v60  ;;  %v607_v6 = vmul.f32 %v602_v63, %v2197_v48 }
  0xcb   :  { %274 = vrot.lane.b32.xlu0 %v263_v62, %s1986_s10  ;;  %v613_v19 = vcombine.high %v607_v6, %v607_v6 }
  0xcc   :  { %278 = vrot.lane.b32.xlu1 %v264_v10, %s1986_s10 }
  0xcf   :  { %143 = vrot.lane.b32.xlu0 %v134_v15, %s1985_s9 }
  0xd0   :  { %415 = vrot.lane.b32.xlu1 %v401_v29, %s1981_s29 }
  0xd3   :  { %280 = vrot.lane.b32.xlu0 %v271_v33, %s1986_s10 }
  0xd4   :  { %552 = vrot.lane.b32.xlu1 %v538_v37, %s1982_s30 }
  0xd7   :  { %344 = vrot.lane.b32.xlu0 %v333_v35, %s1983_s7 }
  0xd8   :  { %342 = vrot.lane.b32.xlu1 %v338_v31, %s1983_s7 }
  0xdb   :  { %481 = vrot.lane.b32.xlu0 %v470_v24, %s1984_s8 }
  0xdc   :  { %479 = vrot.lane.b32.xlu1 %v475_v40, %s1984_s8 }
  0xdf   :  { %417 = vrot.lane.b32.xlu0 %v408_v30, %s1981_s29 }
  0xe0   :  { %139 = vrot.lane.b32.xlu1 %v133_v43, %s1985_s9 }
  0xe3   :  { %205 = vrot.lane.b32.xlu0 %v201_v32, %s1980_s28 }
  0xe4   :  { %276 = vrot.lane.b32.xlu1 %v270_v46, %s1986_s10 }
  0xe7   :  { %135 = vrot.lane.b32.xlu0 %v132_v47, %s1985_s9 }
  0xe8   :  { %209 = vrot.lane.b32.xlu1 %v202_v49, %s1980_s28 }
  0xeb   :  { %272 = vrot.lane.b32.xlu0 %v269_v50, %s1986_s10 }
  0xec   :  { %616 = vrot.lane.b32.xlu1 %v612_v16, %s1987_s11 }
  0xef   :  { %409 = vrot.lane.b32.xlu0 %v406_v12, %s1981_s29 }
  0xf0   :  { %346 = vrot.lane.b32.xlu1 %v339_v51, %s1983_s7 }
  0xf3   :  { %546 = vrot.lane.b32.xlu0 %v543_v52, %s1982_s30 }
  0xf4   :  { %483 = vrot.lane.b32.xlu1 %v476_v53, %s1984_s8 }
  0xf7   :  { %413 = vrot.lane.b32.xlu0 %v407_v55, %s1981_s29 }
  0xf8   :  { %614 = vrot.lane.b32.xlu1 %v606_v45, %s1987_s11 }
  0xfb   :  { %550 = vrot.lane.b32.xlu0 %v544_v59, %s1982_s30 }
  0xfc   :  { %622 = vrot.lane.b32.xlu1 %v608_v21, %s1987_s11 }
  0xff   :  { %554 = vrot.lane.b32.xlu0 %v545_v61, %s1982_s30 }
 0x103   :  { %618 = vrot.lane.b32.xlu0 %v607_v6, %s1987_s11 }
 0x107   :  { %620 = vrot.lane.b32.xlu0 %v613_v19, %s1987_s11 }
 0x121   :  { %v212_v9 = vpop.permute.xlu0 %211 }
 0x122   :  { %v204_v7 = vpop.permute.xlu1 %203 }
 0x126   :  { %v2317_v8 = vpop.permute.xlu1 %411 }
 0x12a   :  { %v2319_v62 = vpop.permute.xlu1 %548 }
 0x12e   :  { %v341_v48 = vpop.permute.xlu1 %340 }
 0x131   :  { %v2321_v10 = vpop.permute.xlu0 %348 }
 0x132   :  { %v478_v11 = vpop.permute.xlu1 %477 }
 0x135   :  { %v2323_v0 = vpop.permute.xlu0 %485 }
 0x136   :  { %v208_v13 = vpop.permute.xlu1 %207 }
 0x139   :  { %v138_v15 = vpop.permute.xlu0 %137 }
 0x13a   :  { %v142_v17 = vpop.permute.xlu1 %141 }
 0x13d   :  { %v275_v18 = vpop.permute.xlu0 %274 }
 0x13e   :  { %v279_v23 = vpop.permute.xlu1 %278 }
 0x141   :  { %v144_v29 = vpop.permute.xlu0 %143 }
 0x142   :  { %v149_v14 = vsel %vm145_vm9, %v142_v17, %v144_v29  ;;  %v2326_v20 = vpop.permute.xlu1 %415 }
 0x143   :  { %157 = vst [vmem:[#allocation2 + $0x18] sm:$0xf0] %v149_v14 }
 0x145   :  { %v281_v22 = vpop.permute.xlu0 %280 }
 0x146   :  { %v286_v33 = vsel %vm282_vm10, %v279_v23, %v281_v22  ;;  %v2329_v34 = vpop.permute.xlu1 %552 }
 0x147   :  { %294 = vst [vmem:[#allocation2 + $0x38] sm:$0xf0] %v286_v33 }
 0x149   :  { %v345_v36 = vpop.permute.xlu0 %344 }
 0x14a   :  { %v343_v37 = vpop.permute.xlu1 %342  ;;  %v641_v59 = vld [vmem:[#allocation2 + $0x18] sm:$0xff] }
 0x14b   :  { %v351_v25 = vsel %vm2796_vm11, %v341_v48, %v343_v37  ;;  %v352_v28 = vsel %vm2796_vm11, %v343_v37, %v345_v36 }
 0x14c   :  { %359 = vst [vmem:[#allocation2 + $0x40] sm:$0xf] %v351_v25  ;;  %360 = vst [vmem:[#allocation2 + $0x48] sm:$0xf] %v352_v28 }
 0x14d   :  { %v2333_v35 = vpop.permute.xlu0 %481 }
 0x14e   :  { %v480_v38 = vpop.permute.xlu1 %479 }
 0x14f   :  { %v488_v31 = vsel %vm2797_vm12, %v478_v11, %v480_v38  ;;  %v489_v39 = vsel %vm2797_vm12, %v480_v38, %v2333_v35 }
 0x150   :  { %496 = vst [vmem:[#allocation2 + $0x60] sm:$0xf] %v488_v31  ;;  %497 = vst [vmem:[#allocation2 + $0x68] sm:$0xf] %v489_v39 }
 0x151   :  { %v418_v24 = vpop.permute.xlu0 %417 }
 0x152   :  { %v423_v27 = vsel %vm419_vm13, %v2326_v20, %v418_v24  ;;  %v140_v40 = vpop.permute.xlu1 %139 }
 0x153   :  { %431 = vst [vmem:[#allocation2 + $0x58] sm:$0xf0] %v423_v27  ;;  %v147_v41 = vsel %vm145_vm9, %v138_v15, %v140_v40  ;;  %v148_v30 = vsel %vm145_vm9, %v140_v40, %v142_v17 }
 0x154   :  { %155 = vst [vmem:[#allocation2 + $0x8] sm:$0xf0] %v147_v41  ;;  %156 = vst [vmem:[#allocation2 + $0x10] sm:$0xf0] %v148_v30 }
 0x155   :  { %v206_v42 = vpop.permute.xlu0 %205 }
 0x156   :  { %v214_v43 = vsel %vm213_vm14, %v204_v7, %v206_v42  ;;  %v215_v32 = vsel %vm213_vm14, %v206_v42, %v208_v13  ;;  %v277_v44 = vpop.permute.xlu1 %276 }
 0x157   :  { %222 = vst [vmem:[#allocation2 + $0x20] sm:$0xf] %v214_v43  ;;  %223 = vst [vmem:[#allocation2 + $0x28] sm:$0xf] %v215_v32  ;;  %v284_v46 = vsel %vm282_vm10, %v275_v18, %v277_v44  ;;  %v285_v45 = vsel %vm282_vm10, %v277_v44, %v279_v23 }
 0x158   :  { %292 = vst [vmem:[#allocation2 + $0x28] sm:$0xf0] %v284_v46  ;;  %293 = vst [vmem:[#allocation2 + $0x30] sm:$0xf0] %v285_v45 }
 0x159   :  { %v136_v47 = vpop.permute.xlu0 %135 }
 0x15a   :  { %v146_v49 = vsel %vm145_vm9, %v136_v47, %v138_v15  ;;  %v210_v16 = vpop.permute.xlu1 %209  ;;  %v637_v47 = vld [vmem:[%s2791_s2] sm:$0xff] }
 0x15b   :  { %154 = vst [vmem:[#allocation2] sm:$0xf0] %v146_v49  ;;  %v216_v50 = vsel %vm213_vm14, %v208_v13, %v210_v16  ;;  %v217_v12 = vsel %vm213_vm14, %v210_v16, %v212_v9  ;;  %v639_v54 = vld [vmem:[#allocation2 + $0x8] sm:$0xff]  ;;  %v640_v63 = vld [vmem:[#allocation2 + $0x10] sm:$0xff] }
 0x15c   :  { %224 = vst [vmem:[#allocation2 + $0x30] sm:$0xf] %v216_v50  ;;  %225 = vst [vmem:[#allocation2 + $0x38] sm:$0xf] %v217_v12 }
 0x15d   :  { %v273_v51 = vpop.permute.xlu0 %272 }
 0x15e   :  { %v283_v52 = vsel %vm282_vm10, %v273_v51, %v275_v18  ;;  %v617_v53 = vpop.permute.xlu1 %616 }
 0x15f   :  { %291 = vst [vmem:[#allocation2 + $0x20] sm:$0xf0] %v283_v52  ;;  %v643_v55 = vld [vmem:[#allocation2 + $0x28] sm:$0xff] }
 0x160   :  { %v1751_v56 = vpack.c.bf16 %v643_v55, %v639_v54 }
 0x161   :  { %v410_v57 = vpop.permute.xlu0 %409 }
 0x162   :  { %v420_v58 = vsel %vm419_vm13, %v410_v57, %v2317_v8  ;;  %v347_v21 = vpop.permute.xlu1 %346  ;;  %1752 = vmatprep.subr.bf16.mxu0 %v1751_v56  ;;  %v638_v13 = vld [vmem:[#allocation2] sm:$0xff] }
 0x163   :  { %428 = vst [vmem:[#allocation2 + $0x40] sm:$0xf0] %v420_v58  ;;  %v353_v60 = vsel %vm2796_vm11, %v345_v36, %v347_v21  ;;  %v354_v26 = vsel %vm2796_vm11, %v347_v21, %v2321_v10  ;;  %v645_v61 = vld [vmem:[#allocation2 + $0x38] sm:$0xff]  ;;  %v644_v6 = vld [vmem:[#allocation2 + $0x30] sm:$0xff]  ;;  %vm624_vm11 = vcmask 769024  }
 0x164   :  { %361 = vst [vmem:[#allocation2 + $0x50] sm:$0xf] %v353_v60  ;;  %362 = vst [vmem:[#allocation2 + $0x58] sm:$0xf] %v354_v26  ;;  %v1759_v19 = vpack.c.bf16 %v645_v61, %v641_v59  ;;  %v1761_v7 = vpack.c.bf16 %v644_v6, %v640_v63  ;;  %v1989_v63 = vmov 0   ;;  %v51_v6 = vld [vmem:[%s2794_s5] sm:$0xff] }
 0x165   :  { %v547_v9 = vpop.permute.xlu0 %546  ;;  %1821 = vset.pattern.permute.xlu0 %v1989_v63  ;;  %1822 = vset.pattern.permute.xlu1 %v1989_v63 }
 0x166   :  { %v557_v48 = vsel %vm556_vm15, %v547_v9, %v2319_v62  ;;  %v484_v11 = vpop.permute.xlu1 %483  ;;  %1760 = vmatprep.subr.bf16.mxu1 %v1759_v19  ;;  %v642_v15 = vld [vmem:[#allocation2 + $0x20] sm:$0xff] }
 0x167   :  { %565 = vst [vmem:[#allocation2 + $0x60] sm:$0xf0] %v557_v48  ;;  %v490_v10 = vsel %vm2797_vm12, %v2333_v35, %v484_v11  ;;  %v491_v17 = vsel %vm2797_vm12, %v484_v11, %v2323_v0  ;;  %1762 = vmatpush1.bf16.msra.mxu1 %v1761_v7  ;;  %v1753_v18 = vpack.c.bf16 %v642_v15, %v638_v13  ;;  %vm658_vm12 = vcmask 293888   ;;  %v931_v19 = vld [vmem:[#allocation8 + $0x1] ss:$8 sm:$0xf] }
 0x168   :  { %498 = vst [vmem:[#allocation2 + $0x70] sm:$0xf] %v490_v10  ;;  %499 = vst [vmem:[#allocation2 + $0x78] sm:$0xf] %v491_v17  ;;  %v936_v7 = vrot.slane %v931_v19, %v2058_v2  ;;  %v940_v9 = vrot.slane %v931_v19, %v2060_v3  ;;  %v948_v48 = vrot.slane %v931_v19, %v2064_v5 }
 0x169   :  { %v414_v23 = vpop.permute.xlu0 %413  ;;  %1754 = vmatpush1.bf16.msra.mxu0 %v1753_v18  ;;  %v1002_v11 = vld [vmem:[#allocation8 + $0x2] ss:$8 sm:$0xf]  ;;  %v1073_v15 = vld [vmem:[#allocation8 + $0x3] ss:$8 sm:$0xf] }
 0x16a   :  { %v421_v29 = vsel %vm419_vm13, %v2317_v8, %v414_v23  ;;  %v422_v14 = vsel %vm419_vm13, %v414_v23, %v2326_v20  ;;  %v615_v22 = vpop.permute.xlu1 %614  ;;  %v646_v24 = vld [vmem:[#allocation2 + $0x40] sm:$0xff]  ;;  %v1011_v13 = vrot.slane %v1002_v11, %v2060_v3  ;;  %v1078_v10 = vrot.slane %v1073_v15, %v2058_v2 }
 0x16b   :  { %429 = vst [vmem:[#allocation2 + $0x48] sm:$0xf0] %v421_v29  ;;  %430 = vst [vmem:[#allocation2 + $0x50] sm:$0xf0] %v422_v14  ;;  %v625_v33 = vsel %vm624_vm11, %v615_v22, %v617_v53  ;;  %v1086_v17 = vrot.slane %v1073_v15, %v2062_v4  ;;  %v1090_v18 = vrot.slane %v1073_v15, %v2064_v5 }
 0x16c   :  { %633 = vst [vmem:[#allocation2 + $0x80] sm:$0xf] %v625_v33  ;;  %v1144_v23 = vld [vmem:[#allocation8 + $0x4] ss:$8 sm:$0xf] }
 0x16d   :  { %v551_v0 = vpop.permute.xlu0 %550  ;;  %v1153_v29 = vrot.slane %v1144_v23, %v2060_v3  ;;  %v2423_v14 = vld [vmem:[#allocation8 + $0x5] ss:$8 sm:$0xf] }
 0x16e   :  { %v558_v36 = vsel %vm556_vm15, %v2319_v62, %v551_v0  ;;  %v559_v37 = vsel %vm556_vm15, %v551_v0, %v2329_v34  ;;  %v650_v28 = vld [vmem:[#allocation2 + $0x60] sm:$0xff]  ;;  %v623_v27 = vpop.permute.xlu1 %622  ;;  %v1220_v22 = vrot.slane %v2423_v14, %v2058_v2 }
 0x16f   :  { %566 = vst [vmem:[#allocation2 + $0x68] sm:$0xf0] %v558_v36  ;;  %567 = vst [vmem:[#allocation2 + $0x70] sm:$0xf0] %v559_v37  ;;  %v1757_v62 = vpack.c.bf16 %v650_v28, %v646_v24 }
 0x171   :  { %v555_v25 = vpop.permute.xlu0 %554 }
 0x172   :  { %v560_v8 = vsel %vm556_vm15, %v2329_v34, %v555_v25  ;;  %v647_v38 = vld [vmem:[#allocation2 + $0x48] sm:$0xff]  ;;  %v649_v34 = vld [vmem:[#allocation2 + $0x58] sm:$0xff]  ;;  %v648_v44 = vld [vmem:[#allocation2 + $0x50] sm:$0xff] }
 0x173   :  { %568 = vst [vmem:[#allocation2 + $0x78] sm:$0xf0] %v560_v8  ;;  %v654_v49 = vld [vmem:[#allocation2 + $0x80] sm:$0xf] }
 0x175   :  { %v619_v20 = vpop.permute.xlu0 %618 }
 0x176   :  { %v626_v35 = vsel %vm624_vm11, %v617_v53, %v619_v20  ;;  %v651_v31 = vld [vmem:[#allocation2 + $0x68] sm:$0xff]  ;;  %v652_v41 = vld [vmem:[#allocation2 + $0x70] sm:$0xff] }
 0x177   :  { %634 = vst [vmem:[#allocation2 + $0x88] sm:$0xf] %v626_v35  ;;  %v1755_v39 = vpack.c.bf16 %v651_v31, %v647_v38  ;;  %v1765_v46 = vpack.c.bf16 %v652_v41, %v648_v44  ;;  %v1007_v41 = vrot.slane %v1002_v11, %v2058_v2  ;;  %v1224_v44 = vrot.slane %v2423_v14, %v2060_v3 }
 0x179   :  { %v621_v40 = vpop.permute.xlu0 %620  ;;  %1756 = vmatprep.subr.bf16.mxu0 %v1755_v39  ;;  %v2435_v39 = vld [vmem:[%s2793_s4] sm:$0xff] }
 0x17a   :  { %v627_v30 = vsel %vm624_vm11, %v619_v20, %v621_v40  ;;  %v628_v42 = vsel %vm624_vm11, %v621_v40, %v623_v27  ;;  %1758 = vmatpush1.bf16.msra.mxu0 %v1757_v62  ;;  %v653_v43 = vld [vmem:[#allocation2 + $0x78] sm:$0xff]  ;;  %v944_v27 = vrot.slane %v931_v19, %v2062_v4  ;;  %v1228_v40 = vrot.slane %v2423_v14, %v2062_v4 }
 0x17b   :  { %635 = vst [vmem:[#allocation2 + $0x90] sm:$0xf] %v627_v30  ;;  %636 = vst [vmem:[#allocation2 + $0x98] sm:$0xf] %v628_v42  ;;  %v1763_v32 = vpack.c.bf16 %v653_v43, %v649_v34  ;;  %v1015_v30 = vrot.slane %v1002_v11, %v2062_v4  ;;  %v1082_v42 = vrot.slane %v1073_v15, %v2060_v3 }
 0x17c   :  { %v1019_v34 = vrot.slane %v1002_v11, %v2064_v5  ;;  %v1149_v43 = vrot.slane %v1144_v23, %v2058_v2 }
 0x17d   :  { %1764 = vmatprep.subr.bf16.mxu1 %v1763_v32  ;;  %v1157_v32 = vrot.slane %v1144_v23, %v2062_v4 }
 0x17e   :  { %1766 = vmatpush1.bf16.msra.mxu1 %v1765_v46  ;;  %v655_v45 = vld [vmem:[#allocation2 + $0x88] sm:$0xf]  ;;  %v1161_v46 = vrot.slane %v1144_v23, %v2064_v5 }
 0x17f   :  { %1743 = vmatprep.subr.msk.mxu0 %vm120_vm5, %v655_v45  ;;  %v1286_v45 = vld [vmem:[#allocation8 + $0x6] ss:$8 sm:$0xf] }
 0x180   :  { %1744 = vmatpush1.msk.msra.mxu0 %vm120_vm5, %v654_v49  ;;  %v1299_v49 = vrot.slane %v1286_v45, %v2062_v4 }
 0x181   :  { %1745 = vmatmul.mubr.msk.f32.vlgmr.msra.gmra.mrb[0].mxu0 %vm658_vm12, %v637_v47 }
 0x182   :  { %v657_v16 = vld [vmem:[#allocation2 + $0x98] sm:$0xf]  ;;  %v656_v50 = vld [vmem:[#allocation2 + $0x90] sm:$0xf]  ;;  %1599 = vmatprep.mubr.f32.mxu0 %v1988_v1 }
 0x183   :  { %1746 = vmatprep.subr.msk.mxu1 %vm120_vm5, %v657_v16  ;;  %v1357_v16 = vld [vmem:[#allocation8 + $0x7] ss:$8 sm:$0xf] }
 0x184   :  { %1747 = vmatpush1.msk.msra.mxu1 %vm120_vm5, %v656_v50  ;;  %v1366_v50 = vrot.slane %v1357_v16, %v2060_v3  ;;  %vm860_vm5 = vcmask 277640   ;;  %v1370_v11 = vrot.slane %v1357_v16, %v2062_v4 }
 0x185   :  { %1748 = vmatmul.mubr.msk.f32.vlgmr.msra.gmra.mrb[0].mxu1 %vm658_vm12, %v637_v47  ;;  %v1291_v47 = vrot.slane %v1286_v45, %v2058_v2  ;;  %861 = vst.msk [vmem:[#allocation4 + $0x20] sm:$0xff] %vm860_vm5, %v1988_v1  ;;  %vm886_vm12 = vcmask 1047688  }
 0x186   :  { %1670 = vmatprep.mubr.f32.mxu1 %v1988_v1  ;;  %v1232_v1 = vrot.slane %v2423_v14, %v2064_v5 }
 0x254   :  { %v2384_v12 = vpop.f32.mrb[0].mxu0 }
 0x255   :  { %v822_v51 = vmul.f32 %v2384_v12, %v2384_v12  ;;  %v2388_v52 = vpop.f32.mrb[1].mxu0 }
 0x256   :  { %v816_v53 = vadd.f32 %v2388_v52, %v2384_v12  ;;  %v823_v54 = vmul.f32 %v2388_v52, %v2388_v52 }
 0x258   :  { %v2394_v55 = vpop.f32.mrb[0].mxu1  ;;  %v826_v56 = vadd.f32 %v823_v54, %v822_v51  ;;  %v1428_v51 = vld [vmem:[#allocation8 + $0x20] ss:$8 sm:$0xf] }
 0x259   :  { %v824_v57 = vmul.f32 %v2394_v55, %v2394_v55  ;;  %v2398_v58 = vpop.f32.mrb[1].mxu1  ;;  %v817_v21 = vadd.f32 %v816_v53, %v2394_v55  ;;  %v1441_v53 = vrot.slane %v1428_v51, %v2062_v4  ;;  %v1437_v15 = vrot.slane %v1428_v51, %v2060_v3 }
 0x25a   :  { %v825_v59 = vmul.f32 %v2398_v58, %v2398_v58 }
 0x25b   :  { %v818_v60 = vadd.f32 %v817_v21, %v2398_v58  ;;  %v827_v26 = vadd.f32 %v826_v56, %v824_v57 }
 0x25d   :  { %819 = vadd.xlane.f32.xlu0 %v818_v60  ;;  %v828_v61 = vadd.f32 %v827_v26, %v825_v59 }
 0x25f   :  { %829 = vadd.xlane.f32.xlu1 %v828_v61 }
 0x270   :  { %852 = vperm.xlu1 %1822, %v51_v6  }
 0x274   :  { %949 = vrot.lane.b32.xlu1 %v936_v7, %s1974_s22 }
 0x278   :  { %951 = vrot.lane.b32.xlu1 %v940_v9, %s1974_s22  ;;  %v1295_v9 = vrot.slane %v1286_v45, %v2060_v3 }
 0x27c   :  { %955 = vrot.lane.b32.xlu1 %v948_v48, %s1974_s22  ;;  %v1362_v48 = vrot.slane %v1357_v16, %v2058_v2 }
 0x280   :  { %1022 = vrot.lane.b32.xlu1 %v1011_v13, %s1975_s23  ;;  %v1374_v13 = vrot.slane %v1357_v16, %v2064_v5 }
 0x284   :  { %1091 = vrot.lane.b32.xlu1 %v1078_v10, %s1973_s1  ;;  %v1445_v10 = vrot.slane %v1428_v51, %v2064_v5 }
 0x288   :  { %1095 = vrot.lane.b32.xlu1 %v1086_v17, %s1973_s1 }
 0x28c   :  { %1097 = vrot.lane.b32.xlu1 %v1090_v18, %s1973_s1 }
 0x290   :  { %1164 = vrot.lane.b32.xlu1 %v1153_v29, %s1978_s26 }
 0x294   :  { %1233 = vrot.lane.b32.xlu1 %v1220_v22, %s1976_s24 }
 0x298   :  { %1237 = vrot.lane.b32.xlu1 %v1228_v40, %s1976_s24 }
 0x2ea   :  { %v820_v33 = vpop.xlane.xlu0 %819 }
 0x2eb   :  { %v821_v0 = vmul.f32 0.001953125, %v820_v33 }
 0x2ec   :  { %v830_v36 = vpop.xlane.xlu1 %829 }
 0x2ed   :  { %v831_v37 = vmul.f32 0.001953125, %v830_v36  ;;  %v832_v25 = vmul.f32 %v821_v0, %v821_v0  ;;  %v834_v8 = vsub.f32 %v2384_v12, %v821_v0  ;;  %v835_v20 = vsub.f32 %v2388_v52, %v821_v0 }
 0x2ee   :  { %v836_v28 = vsub.f32 %v2394_v55, %v821_v0  ;;  %v837_v35 = vsub.f32 %v2398_v58, %v821_v0  ;;  %v1303_v12 = vrot.slane %v1286_v45, %v2064_v5  ;;  %v1433_v52 = vrot.slane %v1428_v51, %v2058_v2 }
 0x2ef   :  { %v833_v38 = vsub.f32 %v831_v37, %v832_v25 }
 0x2f0   :  { %v2472_v55 = vpop.permute.xlu1 %852 }
 0x2f1   :  { %v838_v31 = vadd.f32 1e-05, %v833_v38 }
 0x2f3   :  { %1893 = vrsqrt.f32 %v838_v31 }
 0x2f4   :  { %v2510_v17 = vpop.permute.xlu1 %949 }
 0x2f8   :  { %v952_v18 = vpop.permute.xlu1 %951 }
 0x2fc   :  { %v956_v29 = vpop.permute.xlu1 %955 }
 0x2fd   :  { %v1894_v24 = vpop.eup %1893 }
 0x2fe   :  { %v840_v62 = vmul.f32 %v1894_v24, %v2435_v39 }
 0x300   :  { %843 = vperm.xlu0 %1821, %v840_v62   ;;  %v2514_v22 = vpop.permute.xlu1 %1022 }
 0x304   :  { %953 = vrot.lane.b32.xlu0 %v944_v27, %s1974_s22  ;;  %v2518_v0 = vpop.permute.xlu1 %1091 }
 0x308   :  { %1020 = vrot.lane.b32.xlu0 %v1007_v41, %s1975_s23  ;;  %v2520_v37 = vpop.permute.xlu1 %1095 }
 0x30c   :  { %1024 = vrot.lane.b32.xlu0 %v1015_v30, %s1975_s23 }
 0x310   :  { %1093 = vrot.lane.b32.xlu0 %v1082_v42, %s1973_s1 }
 0x314   :  { %1026 = vrot.lane.b32.xlu0 %v1019_v34, %s1975_s23 }
 0x318   :  { %1162 = vrot.lane.b32.xlu0 %v1149_v43, %s1978_s26 }
 0x31c   :  { %1166 = vrot.lane.b32.xlu0 %v1157_v32, %s1978_s26 }
 0x320   :  { %1235 = vrot.lane.b32.xlu0 %v1224_v44, %s1976_s24 }
 0x324   :  { %1168 = vrot.lane.b32.xlu0 %v1161_v46, %s1978_s26 }
 0x328   :  { %1304 = vrot.lane.b32.xlu0 %v1291_v47, %s1972_s19 }
 0x32c   :  { %1308 = vrot.lane.b32.xlu0 %v1299_v49, %s1972_s19 }
 0x330   :  { %1377 = vrot.lane.b32.xlu0 %v1366_v50, %s1977_s25 }
 0x334   :  { %1310 = vrot.lane.b32.xlu0 %v1303_v12, %s1972_s19 }
 0x338   :  { %1446 = vrot.lane.b32.xlu0 %v1433_v52, %s1979_s27 }
 0x33c   :  { %1450 = vrot.lane.b32.xlu0 %v1441_v53, %s1979_s27 }
 0x37f   :  { %v844_v54 = vpop.permute.xlu0 %843 }
 0x380   :  { %v846_v56 = vmul.f32 %v844_v54, %v834_v8  ;;  %v847_v57 = vmul.f32 %v844_v54, %v835_v20  ;;  %v848_v21 = vmul.f32 %v844_v54, %v836_v28  ;;  %v849_v26 = vmul.f32 %v844_v54, %v837_v35  ;;  %v2524_v8 = vpop.permute.xlu1 %1097 }
 0x382   :  { %v2475_v58 = vadd.f32 %v2472_v55, %v846_v56  ;;  %v2479_v60 = vadd.f32 %v2472_v55, %v847_v57  ;;  %v2485_v63 = vadd.f32 %v2472_v55, %v848_v21  ;;  %v2490_v19 = vadd.f32 %v2472_v55, %v849_v26 }
 0x383   :  { %v954_v23 = vpop.permute.xlu0 %953 }
 0x384   :  { %v862_v59 = vmax.f32 %v2475_v58, 0.0  ;;  %v863_v61 = vmax.f32 %v2479_v60, 0.0  ;;  %v864_v6 = vmax.f32 %v2485_v63, 0.0  ;;  %v865_v7 = vmax.f32 %v2490_v19, 0.0  ;;  %v2526_v20 = vpop.permute.xlu1 %1164 }
 0x385   :  { %v958_v26 = vsel %vm118_vm6, %v952_v18, %v954_v23 }
 0x386   :  { %870 = vrot.lane.b32.xlu1 %v862_v59, %s1978_s26 }
 0x387   :  { %v2512_v14 = vpop.permute.xlu0 %1020 }
 0x388   :  { %v2530_v35 = vpop.permute.xlu1 %1233 }
 0x38a   :  { %872 = vrot.lane.b32.xlu1 %v863_v61, %s1978_s26 }
 0x38b   :  { %v2516_v33 = vpop.permute.xlu0 %1024 }
 0x38c   :  { %v2534_v31 = vpop.permute.xlu1 %1237 }
 0x38e   :  { %874 = vrot.lane.b32.xlu1 %v864_v6, %s1978_s26  ;;  %v959_v6 = vsel %vm118_vm6, %v954_v23, %v956_v29 }
 0x38f   :  { %v1094_v36 = vpop.permute.xlu0 %1093 }
 0x392   :  { %876 = vrot.lane.b32.xlu1 %v865_v7, %s1978_s26 }
 0x393   :  { %v2522_v25 = vpop.permute.xlu0 %1026 }
 0x396   :  { %1239 = vrot.lane.b32.xlu1 %v1232_v1, %s1976_s24 }
 0x397   :  { %v2528_v28 = vpop.permute.xlu0 %1162 }
 0x39a   :  { %1306 = vrot.lane.b32.xlu1 %v1295_v9, %s1972_s19  ;;  %v957_v9 = vsel %vm118_vm6, %v2510_v17, %v952_v18  ;;  %v1029_v18 = vsel %vm188_vm0, %v2514_v22, %v2516_v33 }
 0x39b   :  { %v2532_v38 = vpop.permute.xlu0 %1166 }
 0x39e   :  { %1375 = vrot.lane.b32.xlu1 %v1362_v48, %s1977_s25 }
 0x39f   :  { %v2536_v24 = vpop.permute.xlu0 %1235 }
 0x3a2   :  { %1379 = vrot.lane.b32.xlu1 %v1370_v11, %s1977_s25 }
 0x3a3   :  { %v2538_v27 = vpop.permute.xlu0 %1168 }
 0x3a6   :  { %1381 = vrot.lane.b32.xlu1 %v1374_v13, %s1977_s25 }
 0x3a7   :  { %v2543_v30 = vpop.permute.xlu0 %1304 }
 0x3aa   :  { %1448 = vrot.lane.b32.xlu1 %v1437_v15, %s1979_s27  ;;  %v1100_v15 = vsel %vm256_vm7, %v1094_v36, %v2520_v37 }
 0x3ab   :  { %v2548_v32 = vpop.permute.xlu0 %1308 }
 0x3ae   :  { %1452 = vrot.lane.b32.xlu1 %v1445_v10, %s1979_s27 }
 0x3af   :  { %v2554_v45 = vpop.permute.xlu0 %1377 }
 0x3b3   :  { %v2567_v51 = vpop.permute.xlu0 %1310 }
 0x3b7   :  { %v2582_v59 = vpop.permute.xlu0 %1446 }
 0x3f8   :  { %v871_v62 = vpop.permute.xlu1 %870 }
 0x3f9   :  { %887 = vst.msk [vmem:[#allocation4] sm:$0xff] %vm886_vm12, %v871_v62 }
 0x3fc   :  { %v873_v40 = vpop.permute.xlu1 %872 }
 0x3fd   :  { %v2541_v41 = vsel %vm325_vm3, %v871_v62, %v873_v40  ;;  %v1099_v62 = vsel %vm256_vm7, %v2518_v0, %v1094_v36  ;;  %v1030_v36 = vsel %vm188_vm0, %v2516_v33, %v2522_v25 }
 0x3fe   :  { %v966_v13 = vmul.f32 %v957_v9, %v2541_v41 }
 0x400   :  { %v875_v42 = vpop.permute.xlu1 %874  ;;  %v2580_v21 = vld [vmem:[#allocation4] sm:$0xff] }
 0x401   :  { %v2546_v34 = vsel %vm325_vm3, %v873_v40, %v875_v42  ;;  %v1462_v48 = vmul.f32 %v2582_v59, %v2580_v21  ;;  %v965_v10 = vmul.f32 %v2580_v21, %v2510_v17  ;;  %v1108_v17 = vmul.f32 %v1099_v62, %v2541_v41 }
 0x402   :  { %v967_v1 = vmul.f32 %v958_v26, %v2546_v34  ;;  %v1036_v33 = vmul.f32 %v2580_v21, %v2512_v14 }
 0x404   :  { %v877_v43 = vpop.permute.xlu1 %876  ;;  %v1823_v23 = vpack.i.bf16 %v967_v1, %v966_v13 }
 0x405   :  { %v2551_v44 = vsel %vm325_vm3, %v875_v42, %v877_v43  ;;  %891 = vst.msk [vmem:[#allocation4 + $0x20] sm:$0xff] %vm325_vm3, %v877_v43  ;;  %v1038_v42 = vmul.f32 %v1029_v18, %v2546_v34  ;;  %v1028_v43 = vsel %vm188_vm0, %v2512_v14, %v2514_v22  ;;  %v1170_v14 = vsel %vm325_vm3, %v2528_v28, %v2526_v20 }
 0x406   :  { %v968_v11 = vmul.f32 %v959_v6, %v2551_v44  ;;  %v1178_v18 = vmul.f32 %v2580_v21, %v2528_v28  ;;  %vm2798_vm0 = vcmask 908288  }
 0x408   :  { %v1240_v46 = vpop.permute.xlu1 %1239  ;;  %v1828_v40 = vpack.i.bf16 %v968_v11, %v965_v10 }
 0x409   :  { %v1243_v6 = vsel %vm393_vm1, %v2534_v31, %v1240_v46 }
 0x40c   :  { %v2556_v47 = vld [vmem:[#allocation4 + $0x20] sm:$0xff]  ;;  %v2558_v49 = vpop.permute.xlu1 %1306 }
 0x40d   :  { %v969_v16 = vmul.f32 %v2556_v47, %v956_v29  ;;  %v1040_v50 = vmul.f32 %v2556_v47, %v2522_v25  ;;  %v1111_v52 = vmul.f32 %v2556_v47, %v2524_v8  ;;  %v1182_v53 = vmul.f32 %v2556_v47, %v2538_v27 }
 0x40e   :  { %v1253_v56 = vmul.f32 %v1240_v46, %v2556_v47  ;;  %v1324_v57 = vmul.f32 %v2567_v51, %v2556_v47  ;;  %v1109_v29 = vmul.f32 %v1100_v15, %v2546_v34  ;;  %v1171_v25 = vsel %vm325_vm3, %v2526_v20, %v2532_v38 }
 0x40f   :  { %983 = vrot.lane.b32.xlu0 %v969_v16, %s1985_s9  ;;  %1054 = vrot.lane.b32.xlu1 %v1040_v50, %s1980_s28  ;;  %v1101_v16 = vsel %vm256_vm7, %v2520_v37, %v2524_v8  ;;  %v1037_v50 = vmul.f32 %v1028_v43, %v2541_v41  ;;  %v1242_v37 = vsel %vm393_vm1, %v2536_v24, %v2534_v31 }
 0x410   :  { %v2565_v12 = vpop.permute.xlu1 %1375  ;;  %v1251_v26 = vmul.f32 %v1242_v37, %v2546_v34  ;;  %v1180_v1 = vmul.f32 %v1171_v25, %v2546_v34  ;;  %v1252_v31 = vmul.f32 %v1243_v6, %v2551_v44  ;;  %v1249_v15 = vmul.f32 %v2580_v21, %v2530_v35  ;;  %v896_v6 = vld [vmem:[#allocation8] ss:$8 sm:$0xf] }
 0x411   :  { %v1833_v22 = vpack.i.bf16 %v1038_v42, %v1037_v50  ;;  %v1312_v10 = vsel %vm462_vm4, %v2543_v30, %v2558_v49 }
 0x413   :  { %1125 = vrot.lane.b32.xlu0 %v1111_v52, %s1986_s10  ;;  %1196 = vrot.lane.b32.xlu1 %v1182_v53, %s1983_s7  ;;  %v1838_v52 = vpack.i.bf16 %v1109_v29, %v1108_v17  ;;  %v1110_v53 = vmul.f32 %v1101_v16, %v2551_v44  ;;  %v1321_v29 = vmul.f32 %v1312_v10, %v2541_v41 }
 0x414   :  { %v2575_v54 = vpop.permute.xlu1 %1379 }
 0x415   :  { %v1384_v11 = vsel %vm530_vm2, %v2554_v45, %v2575_v54 }
 0x417   :  { %1267 = vrot.lane.b32.xlu0 %v1253_v56, %s1981_s29  ;;  %1338 = vrot.lane.b32.xlu1 %v1324_v57, %s1984_s8  ;;  %v1039_v56 = vmul.f32 %v1030_v36, %v2551_v44  ;;  %v1107_v57 = vmul.f32 %v2580_v21, %v2518_v0  ;;  %v1241_v0 = vsel %vm393_vm1, %v2530_v35, %v2536_v24  ;;  %vm2799_vm1 = vmmov %vm2798_vm0 }
 0x418   :  { %v2587_v61 = vpop.permute.xlu1 %1381  ;;  %v1250_v9 = vmul.f32 %v1241_v0, %v2541_v41  ;;  %v1172_v24 = vsel %vm325_vm3, %v2532_v38, %v2538_v27  ;;  %v1313_v38 = vsel %vm462_vm4, %v2558_v49, %v2548_v32  ;;  %v1383_v27 = vsel %vm530_vm2, %v2565_v12, %v2554_v45  ;;  %vm2801_vm3 = vmmov %vm2798_vm0 }
 0x419   :  { %v1395_v7 = vmul.f32 %v2587_v61, %v2556_v47  ;;  %v1848_v8 = vpack.i.bf16 %v1110_v53, %v1107_v57  ;;  %v1181_v13 = vmul.f32 %v1172_v24, %v2551_v44  ;;  %v1868_v35 = vpack.i.bf16 %v1252_v31, %v1249_v15 }
 0x41a   :  { %v1858_v46 = vpack.i.bf16 %v1251_v26, %v1250_v9  ;;  %v1322_v62 = vmul.f32 %v1313_v38, %v2546_v34  ;;  %v1385_v49 = vsel %vm530_vm2, %v2575_v54, %v2587_v61  ;;  %v1314_v45 = vsel %vm462_vm4, %v2548_v32, %v2567_v51  ;;  %v1451_v61 = vpop.permute.xlu0 %1450  ;;  %vm2800_vm2 = vmmov %vm2798_vm0 }
 0x41b   :  { %1409 = vrot.lane.b32.xlu0 %v1395_v7, %s1982_s30  ;;  %1472 = vrot.lane.b32.xlu1 %v1462_v48, %s1987_s11  ;;  %v1843_v7 = vpack.i.bf16 %v1039_v56, %v1036_v33  ;;  %v1179_v48 = vmul.f32 %v1170_v14, %v2541_v41  ;;  %v1392_v42 = vmul.f32 %v1383_v27, %v2541_v41  ;;  %vm2802_vm4 = vcmask 785408  }
 0x41c   :  { %v1394_v43 = vmul.f32 %v1385_v49, %v2551_v44  ;;  %v1449_v17 = vpop.permute.xlu1 %1448  ;;  %v1873_v16 = vpack.i.bf16 %v1322_v62, %v1321_v29  ;;  %v1323_v50 = vmul.f32 %v1314_v45, %v2551_v44  ;;  %v1391_v54 = vmul.f32 %v2580_v21, %v2565_v12  ;;  %vm2803_vm6 = vmmov %vm2802_vm4 }
 0x41d   :  { %v1853_v20 = vpack.i.bf16 %v1180_v1, %v1179_v48  ;;  %v1320_v32 = vmul.f32 %v2580_v21, %v2543_v30  ;;  %v1455_v36 = vsel %vm599_vm8, %v1449_v17, %v1451_v61  ;;  %v1454_v53 = vsel %vm599_vm8, %v2582_v59, %v1449_v17  ;;  %vm2804_vm7 = vmmov %vm2802_vm4 }
 0x41e   :  { %v1888_v51 = vpack.i.bf16 %v1394_v43, %v1391_v54  ;;  %v1464_v12 = vmul.f32 %v1455_v36, %v2546_v34  ;;  %v1463_v56 = vmul.f32 %v1454_v53, %v2541_v41  ;;  %v901_v14 = vrot.slane %v896_v6, %v2058_v2 }
 0x41f   :  { %1824 = vrot.lane.b32.xlu0 %v1823_v23, %s1985_s9  ;;  %1829 = vrot.lane.b32.xlu1 %v1828_v40, %s1985_s9  ;;  %v1393_v23 = vmul.f32 %v1384_v11, %v2546_v34  ;;  %v1863_v40 = vpack.i.bf16 %v1181_v13, %v1178_v18  ;;  %v909_v9 = vrot.slane %v896_v6, %v2062_v4 }
 0x420   :  { %v913_v48 = vrot.slane %v896_v6, %v2064_v5  ;;  %v918_v10 = vmul.f32 %v2580_v21, %v901_v14 }
 0x421   :  { %v1878_v28 = vpack.i.bf16 %v1393_v23, %v1392_v42  ;;  %v920_v38 = vmul.f32 %v909_v9, %v2546_v34 }
 0x422   :  { %v921_v2 = vmul.f32 %v913_v48, %v2551_v44 }
 0x423   :  { %1839 = vrot.lane.b32.xlu0 %v1838_v52, %s1986_s10  ;;  %1834 = vrot.lane.b32.xlu1 %v1833_v22, %s1980_s28  ;;  %v1883_v52 = vpack.i.bf16 %v1323_v50, %v1320_v32  ;;  %v1453_v22 = vpop.permute.xlu1 %1452 }
 0x424   :  { %v1456_v57 = vsel %vm599_vm8, %v1451_v61, %v1453_v22  ;;  %v1466_v37 = vmul.f32 %v1453_v22, %v2556_v47  ;;  %v905_v47 = vrot.slane %v896_v6, %v2060_v3  ;;  %vm2805_vm8 = vmmov %vm2802_vm4 }
 0x425   :  { %v1465_v30 = vmul.f32 %v1456_v57, %v2551_v44 }
 0x426   :  { %v919_v15 = vmul.f32 %v905_v47, %v2541_v41 }
 0x427   :  { %1849 = vrot.lane.b32.xlu0 %v1848_v8, %s1986_s10  ;;  %1844 = vrot.lane.b32.xlu1 %v1843_v7, %s1980_s28 }
 0x42b   :  { %1859 = vrot.lane.b32.xlu0 %v1858_v46, %s1981_s29  ;;  %1854 = vrot.lane.b32.xlu1 %v1853_v20, %s1983_s7 }
 0x42f   :  { %1869 = vrot.lane.b32.xlu0 %v1868_v35, %s1981_s29  ;;  %1864 = vrot.lane.b32.xlu1 %v1863_v40, %s1983_s7 }
 0x433   :  { %1879 = vrot.lane.b32.xlu0 %v1878_v28, %s1982_s30  ;;  %1874 = vrot.lane.b32.xlu1 %v1873_v16, %s1984_s8 }
 0x437   :  { %1889 = vrot.lane.b32.xlu0 %v1888_v51, %s1982_s30  ;;  %1884 = vrot.lane.b32.xlu1 %v1883_v52, %s1984_s8 }
 0x43b   :  { %1476 = vrot.lane.b32.xlu0 %v1464_v12, %s1987_s11  ;;  %1474 = vrot.lane.b32.xlu1 %v1463_v56, %s1987_s11 }
 0x43f   :  { %1478 = vrot.lane.b32.xlu0 %v1465_v30, %s1987_s11  ;;  %1480 = vrot.lane.b32.xlu1 %v1466_v37, %s1987_s11 }
 0x481   :  { %v984_v59 = vpop.permute.xlu0 %983  ;;  %v1055_v33 = vpop.permute.xlu1 %1054 }
 0x485   :  { %v1126_v25 = vpop.permute.xlu0 %1125  ;;  %v2710_v8 = vpop.permute.xlu1 %1196 }
 0x489   :  { %v2712_v26 = vpop.permute.xlu0 %1267  ;;  %v2714_v0 = vpop.permute.xlu1 %1338 }
 0x48d   :  { %v2716_v7 = vpop.permute.xlu0 %1409  ;;  %v2718_v1 = vpop.permute.xlu1 %1472 }
 0x491   :  { %v1825_v24 = vpop.permute.xlu0 %1824  ;;  %v1830_v31 = vpop.permute.xlu1 %1829 }
 0x492   :  { %v1827_v46 = vunpack.i.h.bf16 %v1825_v24  ;;  %v1826_v11 = vunpack.i.l.bf16 %v1825_v24  ;;  %v1832_v20 = vunpack.i.h.bf16 %v1830_v31  ;;  %v1831_v13 = vunpack.i.l.bf16 %v1830_v31 }
 0x494   :  { %v986_v3 = vsel %vm145_vm9, %v1826_v11, %v1827_v46  ;;  %v987_v4 = vsel %vm145_vm9, %v1827_v46, %v1832_v20  ;;  %v985_v5 = vsel %vm145_vm9, %v1831_v13, %v1826_v11  ;;  %v988_v35 = vsel %vm145_vm9, %v1832_v20, %v984_v59 }
 0x495   :  { %v1840_v27 = vpop.permute.xlu0 %1839  ;;  %v1767_v18 = vpack.c.bf16 %v986_v3, %v919_v15  ;;  %v1785_v23 = vpack.c.bf16 %v987_v4, %v920_v38  ;;  %v1769_v29 = vpack.c.bf16 %v985_v5, %v918_v10  ;;  %v1835_v62 = vpop.permute.xlu1 %1834  ;;  %v1783_v34 = vpack.c.bf16 %v988_v35, %v921_v2 }
 0x496   :  { %v1842_v41 = vunpack.i.h.bf16 %v1840_v27  ;;  %v1841_v49 = vunpack.i.l.bf16 %v1840_v27  ;;  %v1837_v21 = vunpack.i.h.bf16 %v1835_v62  ;;  %v1836_v40 = vunpack.i.l.bf16 %v1835_v62 }
 0x497   :  { %1768 = vmatprep.subr.bf16.mxu0 %v1767_v18  ;;  %1784 = vmatprep.subr.bf16.mxu1 %v1783_v34  ;;  %vm1531_vm9 = vcmask 588800  }
 0x498   :  { %1770 = vmatpush1.bf16.msra.mxu0 %v1769_v29  ;;  %v1128_v44 = vsel %vm282_vm10, %v1841_v49, %v1842_v41  ;;  %v1057_v42 = vsel %vm213_vm14, %v1836_v40, %v1837_v21  ;;  %1786 = vmatpush1.bf16.msra.mxu1 %v1785_v23 }
 0x499   :  { %v1850_v45 = vpop.permute.xlu0 %1849  ;;  %v1845_v28 = vpop.permute.xlu1 %1844  ;;  %v1771_v16 = vpack.c.bf16 %v1128_v44, %v1057_v42 }
 0x49a   :  { %v1852_v43 = vunpack.i.h.bf16 %v1850_v45  ;;  %v1851_v17 = vunpack.i.l.bf16 %v1850_v45  ;;  %v1847_v50 = vunpack.i.h.bf16 %v1845_v28  ;;  %v1846_v54 = vunpack.i.l.bf16 %v1845_v28 }
 0x49b   :  { %1772 = vmatprep.subr.bf16.mxu0 %v1771_v16 }
 0x49c   :  { %v1127_v61 = vsel %vm282_vm10, %v1851_v17, %v1841_v49  ;;  %v1129_v32 = vsel %vm282_vm10, %v1842_v41, %v1852_v43  ;;  %v1130_v51 = vsel %vm282_vm10, %v1852_v43, %v1126_v25  ;;  %v1056_v36 = vsel %vm213_vm14, %v1846_v54, %v1836_v40 }
 0x49d   :  { %v1058_v52 = vsel %vm213_vm14, %v1837_v21, %v1847_v50  ;;  %v1860_v53 = vpop.permute.xlu0 %1859  ;;  %v1059_v22 = vsel %vm213_vm14, %v1847_v50, %v1055_v33  ;;  %v1773_v12 = vpack.c.bf16 %v1127_v61, %v1056_v36  ;;  %v1855_v57 = vpop.permute.xlu1 %1854 }
 0x49e   :  { %v1789_v56 = vpack.c.bf16 %v1129_v32, %v1058_v52  ;;  %v1862_v30 = vunpack.i.h.bf16 %v1860_v53  ;;  %v1861_v37 = vunpack.i.l.bf16 %v1860_v53  ;;  %v1857_v59 = vunpack.i.h.bf16 %v1855_v57 }
 0x49f   :  { %v1856_v6 = vunpack.i.l.bf16 %v1855_v57  ;;  %v1787_v47 = vpack.c.bf16 %v1130_v51, %v1059_v22  ;;  %1774 = vmatpush1.bf16.msra.mxu0 %v1773_v12  ;;  %v1494_v12 = vld [vmem:[%s2792_s3] sm:$0xff]  ;;  %s1990_s3 = smov [#allocation10]  }
 0x4a0   :  { %v1270_v14 = vsel %vm419_vm13, %v1861_v37, %v1862_v30  ;;  %s1733_s17 = sshll.u32 %s1990_s3, 4  ;;  %s1734_s17 = int_to_ptr.vmem [resolvable:$true] %s1733_s17 }
 0x4a1   :  { %1788 = vmatprep.subr.bf16.mxu1 %v1787_v47  ;;  %v1870_v25 = vpop.permute.xlu0 %1869  ;;  %v1199_v9 = vsel %vm2798_vm0, %v1856_v6, %v1857_v59  ;;  %v1865_v48 = vpop.permute.xlu1 %1864  ;;  %s1941_s18 = scalar_lea.vmem %s1734_s17, 512  ;;  %p1946_p3 = scmp.lt.s32.totalorder %s1734_s17, %s1734_s17 }
 0x4a2   :  { %1790 = vmatpush1.bf16.msra.mxu1 %v1789_v56  ;;  %v1872_v24 = vunpack.i.h.bf16 %v1870_v25  ;;  %v1871_v31 = vunpack.i.l.bf16 %v1870_v25  ;;  %v1775_v33 = vpack.c.bf16 %v1270_v14, %v1199_v9  ;;  %v1867_v46 = vunpack.i.h.bf16 %v1865_v48  ;;  %p1942_p2 = scmp.ne.s32.totalorder %s1734_s17, %s1941_s18  ;;  %p1947_p4 = scmp.lt.s32.totalorder %s1941_s18, %s1941_s18 }
 0x4a3   :  { %v1866_v11 = vunpack.i.l.bf16 %v1865_v48 }
 0x4a4   :  { %v1269_v20 = vsel %vm419_vm13, %v1871_v31, %v1861_v37  ;;  %v1271_v13 = vsel %vm419_vm13, %v1862_v30, %v1872_v24  ;;  %1776 = vmatprep.subr.bf16.mxu0 %v1775_v33  ;;  %v1272_v15 = vsel %vm419_vm13, %v1872_v24, %v2712_v26  ;;  %v1200_v38 = vsel %vm2800_vm2, %v1857_v59, %v1867_v46  ;;  %p1948_p5 = por %p1947_p4, %p1946_p3 }
 0x4a5   :  { %v1198_v10 = vsel %vm2799_vm1, %v1866_v11, %v1856_v6  ;;  %v1880_v3 = vpop.permute.xlu0 %1879  ;;  %v1201_v2 = vsel %vm2801_vm3, %v1867_v46, %v2710_v8  ;;  %v1793_v5 = vpack.c.bf16 %v1271_v13, %v1200_v38  ;;  %v1875_v27 = vpop.permute.xlu1 %1874 }
 0x4a6   :  { %v1777_v4 = vpack.c.bf16 %v1269_v20, %v1198_v10  ;;  %v1882_v18 = vunpack.i.h.bf16 %v1880_v3  ;;  %v1881_v35 = vunpack.i.l.bf16 %v1880_v3  ;;  %v1877_v23 = vunpack.i.h.bf16 %v1875_v27  ;;  %p1949_p6 = pnand %p1948_p5, %p1942_p2 }
 0x4a7   :  { %v1876_v29 = vunpack.i.l.bf16 %v1875_v27  ;;  %v1791_v62 = vpack.c.bf16 %v1272_v15, %v1201_v2 }
 0x4a8   :  { %1778 = vmatpush1.bf16.msra.mxu0 %v1777_v4  ;;  %v1412_v41 = vsel %vm556_vm15, %v1881_v35, %v1882_v18 }
 0x4a9   :  { %1792 = vmatprep.subr.bf16.mxu1 %v1791_v62  ;;  %v1890_v26 = vpop.permute.xlu0 %1889  ;;  %v1341_v49 = vsel %vm2802_vm4, %v1876_v29, %v1877_v23  ;;  %v1885_v21 = vpop.permute.xlu1 %1884 }
 0x4aa   :  { %1794 = vmatpush1.bf16.msra.mxu1 %v1793_v5  ;;  %v1892_v40 = vunpack.i.h.bf16 %v1890_v26  ;;  %v1891_v34 = vunpack.i.l.bf16 %v1890_v26  ;;  %v1779_v8 = vpack.c.bf16 %v1412_v41, %v1341_v49  ;;  %v1887_v44 = vunpack.i.h.bf16 %v1885_v21 }
 0x4ab   :  { %v1886_v45 = vunpack.i.l.bf16 %v1885_v21 }
 0x4ac   :  { %v1411_v42 = vsel %vm556_vm15, %v1891_v34, %v1881_v35  ;;  %v1413_v28 = vsel %vm556_vm15, %v1882_v18, %v1892_v40  ;;  %1780 = vmatprep.subr.bf16.mxu0 %v1779_v8  ;;  %v1414_v43 = vsel %vm556_vm15, %v1892_v40, %v2716_v7  ;;  %v1342_v16 = vsel %vm2804_vm7, %v1877_v23, %v1887_v44 }
 0x4ad   :  { %v1340_v17 = vsel %vm2803_vm6, %v1886_v45, %v1876_v29  ;;  %v1477_v50 = vpop.permute.xlu0 %1476  ;;  %v1343_v54 = vsel %vm2805_vm8, %v1887_v44, %v2714_v0  ;;  %v1797_v32 = vpack.c.bf16 %v1413_v28, %v1342_v16  ;;  %v1475_v51 = vpop.permute.xlu1 %1474 }
 0x4ae   :  { %v1781_v61 = vpack.c.bf16 %v1411_v42, %v1340_v17  ;;  %v1795_v36 = vpack.c.bf16 %v1414_v43, %v1343_v54  ;;  %v1483_v52 = vsel %vm624_vm11, %v1475_v51, %v1477_v50  ;;  %v1482_v0 = vsel %vm624_vm11, %v2718_v1, %v1475_v51 }
 0x4b0   :  { %1782 = vmatpush1.bf16.msra.mxu0 %v1781_v61  ;;  %1796 = vmatprep.subr.bf16.mxu1 %v1795_v36 }
 0x4b1   :  { %1551 = vmatprep.subr.mxu0 %v1483_v52  ;;  %1798 = vmatpush1.bf16.msra.mxu1 %v1797_v32  ;;  %v1479_v53 = vpop.permute.xlu0 %1478  ;;  %v1481_v7 = vpop.permute.xlu1 %1480 }
 0x4b2   :  { %v1484_v22 = vsel %vm624_vm11, %v1477_v50, %v1479_v53  ;;  %v1485_v56 = vsel %vm624_vm11, %v1479_v53, %v1481_v7 }
 0x4b3   :  { %1622 = vmatprep.subr.mxu1 %v1485_v56 }
 0x4b4   :  { %1552 = vmatpush1.msra.mxu0 %v1482_v0 }
 0x4b5   :  { %1749 = vmatmul.mubr.msk.f32.vlgmr.msra.gmra.mrb[2].mxu0 %vm1531_vm9, %v1494_v12  ;;  %1623 = vmatpush1.msra.mxu1 %v1484_v22 }
 0x4b6   :  { %1750 = vmatmul.mubr.msk.f32.vlgmr.msra.gmra.mrb[2].mxu1 %vm1531_vm9, %v1494_v12 }
 0x588   :  { %v1601_v57 = vpop.f32.mrb[2].mxu0 }
 0x589   :  { %v1683_v30 = vmul.f32 %v1601_v57, %v1601_v57  ;;  %v1603_v37 = vpop.f32.mrb[3].mxu0  ;;  %v1672_v59 = vpop.f32.mrb[2].mxu1 }
 0x58a   :  { %v1677_v6 = vadd.f32 %v1603_v37, %v1601_v57  ;;  %v1684_v47 = vmul.f32 %v1603_v37, %v1603_v37  ;;  %v1685_v14 = vmul.f32 %v1672_v59, %v1672_v59  ;;  %v1674_v25 = vpop.f32.mrb[3].mxu1 }
 0x58b   :  { %v1686_v1 = vmul.f32 %v1674_v25, %v1674_v25 }
 0x58c   :  { %v1687_v9 = vadd.f32 %v1684_v47, %v1683_v30  ;;  %v1678_v48 = vadd.f32 %v1677_v6, %v1672_v59 }
 0x58e   :  { %v1688_v24 = vadd.f32 %v1687_v9, %v1685_v14  ;;  %v1679_v31 = vadd.f32 %v1678_v48, %v1674_v25 }
 0x590   :  { %v1689_v33 = vadd.f32 %v1688_v24, %v1686_v1  ;;  %1680 = vadd.xlane.f32.xlu0 %v1679_v31 }
 0x592   :  { %1690 = vadd.xlane.f32.xlu1 %v1689_v33 }
 0x61d   :  { %v1681_v46 = vpop.xlane.xlu0 %1680 }
 0x61e   :  { %v1682_v11 = vmul.f32 0.001953125, %v1681_v46 }
 0x61f   :  { %v1691_v20 = vpop.xlane.xlu1 %1690 }
 0x620   :  { %v1692_v13 = vmul.f32 0.001953125, %v1691_v20  ;;  %v1693_v15 = vmul.f32 %v1682_v11, %v1682_v11  ;;  %v1695_v10 = vsub.f32 %v1601_v57, %v1682_v11  ;;  %v1696_v38 = vsub.f32 %v1603_v37, %v1682_v11 }
 0x621   :  { %v1697_v3 = vsub.f32 %v1672_v59, %v1682_v11  ;;  %v1698_v2 = vsub.f32 %v1674_v25, %v1682_v11 }
 0x622   :  { %v1694_v4 = vsub.f32 %v1692_v13, %v1693_v15 }
 0x624   :  { %v1699_v5 = vadd.f32 1e-05, %v1694_v4 }
 0x626   :  { %1895 = vrsqrt.f32 %v1699_v5 }
 0x630   :  { %v1896_v27 = vpop.eup %1895 }
 0x631   :  { %v1701_v18 = vmul.f32 %v1896_v27, %v2435_v39 }
 0x633   :  { %1704 = vperm.xlu0 %1821, %v1701_v18  }
 0x6b2   :  { %v1705_v35 = vpop.permute.xlu0 %1704 }
 0x6b3   :  { %v1707_v23 = vmul.f32 %v1705_v35, %v1695_v10  ;;  %v1708_v29 = vmul.f32 %v1705_v35, %v1696_v38  ;;  %v1709_v62 = vmul.f32 %v1705_v35, %v1697_v3  ;;  %v1710_v41 = vmul.f32 %v1705_v35, %v1698_v2 }
 0x6b5   :  { %v1711_v26 = vadd.f32 %v1707_v23, %v2472_v55  ;;  %v1712_v49 = vadd.f32 %v1708_v29, %v2472_v55  ;;  %v1713_v21 = vadd.f32 %v1709_v62, %v2472_v55  ;;  %v1714_v40 = vadd.f32 %v1710_v41, %v2472_v55 }
 0x6b7   :  { %v1715_v34 = vadd.f32 %v1711_v26, %v2475_v58  ;;  %v1716_v39 = vadd.f32 %v1712_v49, %v2479_v60  ;;  %v1717_v8 = vadd.f32 %v1713_v21, %v2485_v63  ;;  %v1718_v44 = vadd.f32 %v1714_v40, %v2490_v19 }
 0x6b9   :  { %v1719_v45 = vmax.f32 %v1715_v34, 0.0  ;;  %v1720_v42 = vmax.f32 %v1716_v39, 0.0  ;;  %v1721_v28 = vmax.f32 %v1717_v8, 0.0  ;;  %v1722_v43 = vmax.f32 %v1718_v44, 0.0 }
 0x6bb   :  { %1723 = vst [vmem:[#allocation10] sm:$0xff] %v1719_v45  ;;  %1724 = vst [vmem:[#allocation10 + $0x8] sm:$0xff] %v1720_v42 }
 0x6bc   :  { %1725 = vst [vmem:[#allocation10 + $0x10] sm:$0xff] %v1721_v28  ;;  %1726 = vst [vmem:[#allocation10 + $0x18] sm:$0xff] %v1722_v43 }
 0x6bd   :  { %1952 = shalt.err (!%p1949_p6)
}
 0x6be   :  { %s1953_s20 = scalar_lea.hbm %s2795_s6, 512 }
 0x6bf   :  { %p1954_p7 = scmp.ne.s32.totalorder %s2795_s6, %s1953_s20  ;;  %p1957_p8 = scmp.lt.u32.totalorder %s1953_s20, %s2795_s6 }
 0x6c1   :  { %p1959_p9 = pnand %p1957_p8, %p1954_p7 }
 0x6c3   :  { %1962 = shalt.err (!%p1959_p9)
}
 0x6c4   :  { %1736 = dma.vmem_to_hbm [thread:$0]  %s1734_s17, 512, %s2795_s6, [#allocation7]  }
 0x6c5   :  { %1967 = dma.done.wait [#allocation7], 512  }
 0x6c6   :  { %1968 = vsyncadd [#allocation7], 4294966784 }
 0x6c7   :  { %1740 = vsyncpa [#allocation6], 1 }
 0x6c8   :  { %1741 = vsyncpa [#allocation9], 1 }
 0x6c9   :  { %1742 = vsyncpa [#allocation7], 1 }

</bundles_post_ra>
